<compile_context>
chip_gen: v7x
topology: tpu7x:2x2x1
jax: 0.10.0
libtpu: 0.0.40
codegen_flags: <defaults>
</compile_context>

<pallas_src>
import math

import jax
import jax.numpy as jnp
from jax.experimental import pallas as pl
from jax.experimental.pallas import tpu as pltpu

LANE = 128


def _round_up(x, m):
    return (x + m - 1) // m * m


# ----------------------------------------------------------------------------
# Wrapper-side weight preparation (pure XLA, cheap, done under jit).
# ----------------------------------------------------------------------------
def _cheb_block_weight(w):
    """[K, Cin, Cout] -> [K*2*Cin, 2*Cout], per order blockdiag(W_k, W_k).

    Lets the kernel run the Chebyshev recurrence on channel-concatenated
    [x_dis | x_hea] features and emit [out_dis | out_hea] in one contraction
    per order (twice the contraction width of per-branch matmuls)."""
    K, Cin, Cout = w.shape
    z = jnp.zeros_like(w)
    top = jnp.concatenate([w, z], axis=2)   # dis channels -> dis outputs
    bot = jnp.concatenate([z, w], axis=2)   # hea channels -> hea outputs
    return jnp.concatenate([top, bot], axis=1).reshape(K * 2 * Cin, 2 * Cout)


def _enc_fused_weights(p_dis, p_hea, hgc, lg1):
    """Fuse endcoder_dis / endcoder_hea into one block-diagonal MLP whose input
    channel layout matches the per-layer [hD_l | hH_l] slabs the cheb stage
    produces ([hD_0 | hH_0 | hD_1 | hH_1 | ...])."""
    rows = []
    for l in range(lg1):
        d = p_dis["w1"][l * hgc:(l + 1) * hgc]
        h = p_hea["w1"][l * hgc:(l + 1) * hgc]
        rows.append(jnp.concatenate([d, jnp.zeros_like(d)], axis=1))
        rows.append(jnp.concatenate([jnp.zeros_like(h), h], axis=1))
    w1 = jnp.concatenate(rows, axis=0)                                   # [2*lg1*hgc, 2H]
    b1 = jnp.concatenate([p_dis["b1"], p_hea["b1"]], axis=1)
    s1 = jnp.concatenate([p_dis["bn_scale"], p_hea["bn_scale"]], axis=1)
    t1 = jnp.concatenate([p_dis["bn_shift"], p_hea["bn_shift"]], axis=1)
    w2 = jnp.concatenate(
        [jnp.concatenate([p_dis["w2"], jnp.zeros_like(p_dis["w2"])], axis=1),
         jnp.concatenate([jnp.zeros_like(p_hea["w2"]), p_hea["w2"]], axis=1)],
        axis=0)                                                          # [2H, 2*out_dim]
    b2 = jnp.concatenate([p_dis["b2"], p_hea["b2"]], axis=1)
    return w1, b1, s1, t1, w2, b2


def _cls_fused_weights(p_cls, out_dim):
    """Fold go = [dis1 | dis1 - hea1] into the first cls Linear (the kernel can
    then feed enc_out = [dis1 | hea1] directly) and pad the logits to a lane
    multiple so the final store is unmasked (lane-dense out_spec)."""
    w1 = p_cls["w1"]
    w1_eff = jnp.concatenate([w1[:out_dim] + w1[out_dim:], -w1[out_dim:]], axis=0)
    nc = p_cls["w2"].shape[1]
    pad = _round_up(nc, LANE) - nc
    w2 = jnp.pad(p_cls["w2"], ((0, 0), (0, pad)))
    b2 = jnp.pad(p_cls["b2"], ((0, 0), (0, pad)))
    return w1_eff, p_cls["b1"], p_cls["bn_scale"], p_cls["bn_shift"], w2, b2


# ----------------------------------------------------------------------------
# Fused Pallas kernel: ChebConv stack (dis+hea) -> encoders -> classifier.
# ----------------------------------------------------------------------------
def fused_forward(that_bf16, xcat, cheb_wblk, enc, cls, *, K):
    """Returns (enc_out [N, 2*out_dim] = [h0_dis1 | h0_hea1], padded logits)."""
    N = xcat.shape[0]
    lg1 = len(cheb_wblk)
    enc_w1, enc_b1, enc_s, enc_t, enc_w2, enc_b2 = enc
    cls_w1, cls_b1, cls_s, cls_t, cls_w2, cls_b2 = cls
    d_enc = enc_w2.shape[1]          # 2*out_dim (lane-dense, 128)
    d_cls = cls_w2.shape[1]          # num_classes padded to a lane multiple

    def kernel(t_ref, x_ref, *refs):
        w_refs = refs[:lg1]
        (ew1, eb1, es1, et1, ew2, eb2,
         cw1, cb1, cs1, ct1, cw2, cb2,
         enc_out_ref, logit_ref) = refs[lg1:]

        T = t_ref[...]                      # bf16 [N, N]  (halved HBM stream)
        cur = x_ref[...]                    # f32  [N, 2*Cin0] = [x_dis | x_hea]

        parts = []
        for layer in range(lg1):
            w_ref = w_refs[layer]           # [K*2*Cin_l, 2*hgc] block-diagonal
            two_cin = w_ref.shape[0] // K
            # Chebyshev recurrence (K >= 2). T operand in bf16, f32 accumulate;
            # the recurrence arithmetic (2*T@Tx1 - Tx0) stays in f32.
            tx0 = cur
            out = jnp.dot(tx0, w_ref[0:two_cin, :],
                          preferred_element_type=jnp.float32)
            tx1 = jnp.dot(T, tx0.astype(jnp.bfloat16),
                          preferred_element_type=jnp.float32)
            out += jnp.dot(tx1, w_ref[two_cin:2 * two_cin, :],
                           preferred_element_type=jnp.float32)
            for k in range(2, K):           # static -> fully unrolled
                tx2 = 2.0 * jnp.dot(T, tx1.astype(jnp.bfloat16),
                                    preferred_element_type=jnp.float32) - tx0
                out += jnp.dot(tx2, w_ref[k * two_cin:(k + 1) * two_cin, :],
                               preferred_element_type=jnp.float32)
                tx0, tx1 = tx1, tx2
            cur = jnp.maximum(out, 0.0)     # ReLU; [N, 2*hgc] = [hD_l | hH_l]
            parts.append(cur)

        # Fused encoders: first Linear accumulated over per-layer slabs via
        # sublane row-blocks of the fused weight (no lane concat needed).
        two_h = w_refs[0].shape[1]
        h = eb1[...]
        for l, part in enumerate(parts):
            h = h + jnp.dot(part, ew1[l * two_h:(l + 1) * two_h, :],
                            preferred_element_type=jnp.float32)
        h = jnp.maximum(h, 0.0) * es1[...] + et1[...]        # ReLU + BN(eval) fold
        enc_out = jnp.dot(h, ew2[...], preferred_element_type=jnp.float32) + eb2[...]
        enc_out_ref[...] = enc_out                            # [N, 128] = [dis1 | hea1]

        # Classifier (chayi / concat folded into cw1 by the wrapper).
        hc = jnp.dot(enc_out, cw1[...], preferred_element_type=jnp.float32) + cb1[...]
        hc = jnp.maximum(hc, 0.0) * cs1[...] + ct1[...]
        logit_ref[...] = jnp.dot(hc, cw2[...], preferred_element_type=jnp.float32) + cb2[...]

    operands = [that_bf16, xcat, *cheb_wblk,
                enc_w1, enc_b1, enc_s, enc_t, enc_w2, enc_b2,
                cls_w1, cls_b1, cls_s, cls_t, cls_w2, cls_b2]

    return pl.pallas_call(
        kernel,
        out_shape=(jax.ShapeDtypeStruct((N, d_enc), jnp.float32),
                   jax.ShapeDtypeStruct((N, d_cls), jnp.float32)),
        grid=(1,),
        in_specs=[pl.BlockSpec(a.shape, lambda i: (0, 0)) for a in operands],
        out_specs=(pl.BlockSpec((N, d_enc), lambda i: (0, 0)),
                   pl.BlockSpec((N, d_cls), lambda i: (0, 0))),
        compiler_params=pltpu.CompilerParams(dimension_semantics=("arbitrary",)),
    )(*operands)


# ----------------------------------------------------------------------------
# Plain-JAX glue (tiny ops: edge MLP, Laplacian assembly, losses).
# ----------------------------------------------------------------------------
def pae_forward(p, x):
    # TODO(synk): PAE class is not defined in the provided source; approximated
    # as Linear -> ReLU -> Linear -> Sigmoid producing one weight per edge.
    h = jnp.maximum(x @ p["w1"] + p["b1"], 0.0)
    return jax.nn.sigmoid(h @ p["w2"] + p["b2"])[:, 0]


def dense_scaled_laplacian(edge_index, edge_weight, n):
    """Dense L_hat = L_sym - I = -D^{-1/2} A D^{-1/2} (PyG ChebConv, sym, lmax=2).

    Emitted directly in bf16 (the [N,N] operand is the whole HBM footprint of
    the cheb stage); degree / normalization math stays in f32."""
    row, col = edge_index[0], edge_index[1]
    deg = jnp.zeros((n,), jnp.float32).at[row].add(edge_weight)
    dinv = jnp.where(deg > 0, jax.lax.rsqrt(jnp.where(deg > 0, deg, 1.0)), 0.0)
    normw = dinv[row] * edge_weight * dinv[col]
    # message flows source(row) -> target(col): M[col, row] = -normw, diag = 0
    return jnp.zeros((n, n), jnp.bfloat16).at[col, row].add((-normw).astype(jnp.bfloat16))


def ev_gcn_forward(params, features_dis, edge_index_dis, edgenet_input_dis,
                   features_hea, post_ind, nega_ind, *, gl=0.25, tq=0.5):
    n = features_dis.shape[0]
    lg1 = len(params["cheb"])
    K = params["cheb"][0].shape[0]
    hgc = params["cheb"][0].shape[2]
    out_dim = params["enc_dis"]["w2"].shape[1]
    num_classes = params["cls"]["w2"].shape[1]

    # ---- edge_net + graph_learn ---------------------------------------------
    edge_weight = pae_forward(params["pae"], edgenet_input_dis)          # [E]
    m = params["matrix_dis"][:, 0]
    ew = edge_weight - edge_weight * m
    # ||matrix_dis||_2 (spectral) == Frobenius for a single-column matrix.
    norm = jnp.linalg.norm(ew) + jnp.linalg.norm(params["matrix_dis"])
    # edge selection (ew > gl) realised as weight masking -- equivalent for the
    # weighted sym-normalized ChebConv aggregation downstream.
    ew_kept = jnp.where(ew > gl, ew, 0.0)
    that = dense_scaled_laplacian(edge_index_dis, ew_kept, n)            # bf16 [N,N]

    # ---- fused Pallas forward (cheb x lg1 + both encoders + cls, 1 launch) --
    xcat = jnp.concatenate([features_dis, features_hea], axis=1)
    cheb_wblk = [_cheb_block_weight(w) for w in params["cheb"]]
    enc = _enc_fused_weights(params["enc_dis"], params["enc_hea"], hgc, lg1)
    cls = _cls_fused_weights(params["cls"], out_dim)
    enc_out, logit_pad = fused_forward(that, xcat, cheb_wblk, enc, cls, K=K)
    h0_dis1 = enc_out[:, :out_dim]
    h0_hea1 = enc_out[:, out_dim:]
    logit = logit_pad[:, :num_classes]

    # ---- cal_loss (contrastive, torch.cosine_similarity eps=1e-8) -----------
    eps = 1e-8
    num = jnp.sum(h0_dis1 * h0_hea1, axis=1)
    den = jnp.maximum(jnp.linalg.norm(h0_dis1, axis=1), eps) * \
          jnp.maximum(jnp.linalg.norm(h0_hea1, axis=1), eps)
    c = jnp.exp((num / den) / tq)
    loss2 = -jnp.log(jnp.sum(c[post_ind]) / jnp.sum(c[nega_ind]))

    # ---- kk() weight-norm regularizer ----------------------------------------
    loss1 = jnp.sqrt(jnp.sum(params["enc_dis"]["w2"] ** 2)) + \
            jnp.sqrt(jnp.sum(params["enc_hea"]["w2"] ** 2))

    return logit, norm, loss2, loss1


# ----------------------------------------------------------------------------
# Deterministic parameter init (eval-mode BN folded to scale/shift).
# ----------------------------------------------------------------------------
def _kaiming(key, fan_in, fan_out):
    return jax.random.normal(key, (fan_in, fan_out), jnp.float32) * math.sqrt(2.0 / fan_in)


def _mlp_params(keys, d_in, hidden, d_out):
    # BN eval with default running stats (mean=0, var=1, gamma=1, beta=0).
    # For real checkpoints: scale = gamma/sqrt(var+eps), shift = beta - mean*scale.
    bn_scale = jnp.full((1, hidden), 1.0 / math.sqrt(1.0 + 1e-5), jnp.float32)
    return {
        "w1": _kaiming(keys[0], d_in, hidden),
        "b1": jnp.zeros((1, hidden), jnp.float32),
        "bn_scale": bn_scale,
        "bn_shift": jnp.zeros((1, hidden), jnp.float32),
        "w2": _kaiming(keys[1], hidden, d_out),
        "b2": jnp.zeros((1, d_out), jnp.float32),
    }


def make_params(key, *, input_dim, hgc, lg1, K, num_classes, edgenet_dim, num_edge, out_dim):
    keys = jax.random.split(key, 16)
    cheb = []
    for i in range(lg1):
        cin = input_dim if i == 0 else hgc
        std = math.sqrt(2.0 / (cin + hgc))
        cheb.append(jax.random.normal(keys[i], (K, cin, hgc), jnp.float32) * std)
    cls_input_dim = hgc * lg1 * 2            # assumes lg == lg1 (as in the demo config)
    return {
        "cheb": cheb,
        "pae": {
            "w1": _kaiming(keys[4], edgenet_dim, 128),
            "b1": jnp.zeros((128,), jnp.float32),
            "w2": _kaiming(keys[5], 128, 1),
            "b2": jnp.zeros((1,), jnp.float32),
        },
        "enc_dis": _mlp_params(keys[6:8], cls_input_dim // 2, 512, out_dim),
        "enc_hea": _mlp_params(keys[8:10], cls_input_dim // 2, 512, out_dim),
        "cls": _mlp_params(keys[10:12], out_dim * 2, 256, num_classes),
        "matrix_dis": jax.random.normal(keys[12], (num_edge, 1), jnp.float32),
    }


# ----------------------------------------------------------------------------
if __name__ == "__main__":
    N = 16            # graph nodes (subjects)
    input_dim = 32
    hgc = 16
    lg1 = 2
    K = 6
    num_classes = 2
    edgenet_dim = 2
    out_dim = 64
    gl, tq = 0.25, 0.5

    # full upper-triangular edge list (as produced by make_edg, pre-threshold)
    ii, jj = jnp.triu_indices(N, k=1)
    edge_index = jnp.stack([ii, jj]).astype(jnp.int32)          # [2, E]
    E = edge_index.shape[1]

    key = jax.random.PRNGKey(0)
    k_feat_d, k_feat_h, k_edge, k_par = jax.random.split(key, 4)
    features_dis = jax.random.normal(k_feat_d, (N, input_dim), jnp.float32)
    features_hea = jax.random.normal(k_feat_h, (N, input_dim), jnp.float32)
    edgenet_input = jax.random.normal(k_edge, (E, edgenet_dim), jnp.float32)
    post_ind = jnp.arange(0, N // 2, dtype=jnp.int32)
    nega_ind = jnp.arange(N // 2, N, dtype=jnp.int32)

    params = make_params(k_par, input_dim=input_dim, hgc=hgc, lg1=lg1, K=K,
                         num_classes=num_classes, edgenet_dim=edgenet_dim,
                         num_edge=E, out_dim=out_dim)

    fwd = jax.jit(lambda p, fd, ei, en, fh, pi, ni: ev_gcn_forward(
        p, fd, ei, en, fh, pi, ni, gl=gl, tq=tq))

    logit, norm, loss2, loss1 = fwd(params, features_dis, edge_index,
                                    edgenet_input, features_hea,
                                    post_ind, nega_ind)
    jax.block_until_ready((logit, norm, loss2, loss1))
    assert logit.shape == (N, num_classes)
    print("KERNEL_OK")
</pallas_src>

<mosaic_0001>
module attributes {stable_mosaic.version = 11 : i64} {
  func.func @kernel(%arg0: i32, %arg1: memref<16x16xbf16, #tpu.memory_space<vmem>>, %arg2: memref<16x64xf32, #tpu.memory_space<vmem>>, %arg3: memref<384x32xf32, #tpu.memory_space<vmem>>, %arg4: memref<192x32xf32, #tpu.memory_space<vmem>>, %arg5: memref<64x1024xf32, #tpu.memory_space<vmem>>, %arg6: memref<1x1024xf32, #tpu.memory_space<vmem>>, %arg7: memref<1x1024xf32, #tpu.memory_space<vmem>>, %arg8: memref<1x1024xf32, #tpu.memory_space<vmem>>, %arg9: memref<1024x128xf32, #tpu.memory_space<vmem>>, %arg10: memref<1x128xf32, #tpu.memory_space<vmem>>, %arg11: memref<128x256xf32, #tpu.memory_space<vmem>>, %arg12: memref<1x256xf32, #tpu.memory_space<vmem>>, %arg13: memref<1x256xf32, #tpu.memory_space<vmem>>, %arg14: memref<1x256xf32, #tpu.memory_space<vmem>>, %arg15: memref<256x128xf32, #tpu.memory_space<vmem>>, %arg16: memref<1x128xf32, #tpu.memory_space<vmem>>, %arg17: memref<16x128xf32, #tpu.memory_space<vmem>>, %arg18: memref<16x128xf32, #tpu.memory_space<vmem>>) attributes {dimension_semantics = [#tpu.dimension_semantics<arbitrary>], iteration_bounds = array<i64: 1>, scalar_prefetch = 0 : i64, scratch_operands = 0 : i64, tpu.core_type = #tpu.core_type<tc>, window_params = [{pipeline_mode = #tpu.pipeline_mode<synchronous>, transform_indices = @transform_0, window_bounds = array<i64: 16, 16>}, {pipeline_mode = #tpu.pipeline_mode<synchronous>, transform_indices = @transform_1, window_bounds = array<i64: 16, 64>}, {pipeline_mode = #tpu.pipeline_mode<synchronous>, transform_indices = @transform_2, window_bounds = array<i64: 384, 32>}, {pipeline_mode = #tpu.pipeline_mode<synchronous>, transform_indices = @transform_3, window_bounds = array<i64: 192, 32>}, {pipeline_mode = #tpu.pipeline_mode<synchronous>, transform_indices = @transform_4, window_bounds = array<i64: 64, 1024>}, {pipeline_mode = #tpu.pipeline_mode<synchronous>, transform_indices = @transform_5, window_bounds = array<i64: 1, 1024>}, {pipeline_mode = #tpu.pipeline_mode<synchronous>, transform_indices = @transform_6, window_bounds = array<i64: 1, 1024>}, {pipeline_mode = #tpu.pipeline_mode<synchronous>, transform_indices = @transform_7, window_bounds = array<i64: 1, 1024>}, {pipeline_mode = #tpu.pipeline_mode<synchronous>, transform_indices = @transform_8, window_bounds = array<i64: 1024, 128>}, {pipeline_mode = #tpu.pipeline_mode<synchronous>, transform_indices = @transform_9, window_bounds = array<i64: 1, 128>}, {pipeline_mode = #tpu.pipeline_mode<synchronous>, transform_indices = @transform_10, window_bounds = array<i64: 128, 256>}, {pipeline_mode = #tpu.pipeline_mode<synchronous>, transform_indices = @transform_11, window_bounds = array<i64: 1, 256>}, {pipeline_mode = #tpu.pipeline_mode<synchronous>, transform_indices = @transform_12, window_bounds = array<i64: 1, 256>}, {pipeline_mode = #tpu.pipeline_mode<synchronous>, transform_indices = @transform_13, window_bounds = array<i64: 1, 256>}, {pipeline_mode = #tpu.pipeline_mode<synchronous>, transform_indices = @transform_14, window_bounds = array<i64: 256, 128>}, {pipeline_mode = #tpu.pipeline_mode<synchronous>, transform_indices = @transform_15, window_bounds = array<i64: 1, 128>}, {pipeline_mode = #tpu.pipeline_mode<synchronous>, transform_indices = @transform_16, window_bounds = array<i64: 16, 128>}, {pipeline_mode = #tpu.pipeline_mode<synchronous>, transform_indices = @transform_17, window_bounds = array<i64: 16, 128>}]} {
    %c0 = arith.constant 0 : index
    %c0_0 = arith.constant 0 : index
    %0 = vector.load %arg1[%c0, %c0_0] : memref<16x16xbf16, #tpu.memory_space<vmem>>, vector<16x16xbf16>
    %c0_1 = arith.constant 0 : index
    %c0_2 = arith.constant 0 : index
    %1 = vector.load %arg2[%c0_1, %c0_2] : memref<16x64xf32, #tpu.memory_space<vmem>>, vector<16x64xf32>
    %c0_3 = arith.constant 0 : index
    %c0_4 = arith.constant 0 : index
    %2 = vector.load %arg3[%c0_3, %c0_4] : memref<384x32xf32, #tpu.memory_space<vmem>>, vector<64x32xf32>
    %cst = arith.constant dense<0.000000e+00> : vector<16x32xf32>
    %3 = tpu.matmul %1, %2, %cst {dimension_numbers = #tpu.dot_dimension_numbers<[1], [0], [0], [1], [0, 0, 1, 1], [], []>} : vector<16x64xf32>, vector<64x32xf32>, vector<16x32xf32> -> vector<16x32xf32>
    %4 = arith.truncf %1 : vector<16x64xf32> to vector<16x64xbf16>
    %cst_5 = arith.constant dense<0.000000e+00> : vector<16x64xf32>
    %5 = tpu.matmul %0, %4, %cst_5 {dimension_numbers = #tpu.dot_dimension_numbers<[1], [0], [0], [1], [0, 0, 1, 1], [], []>} : vector<16x16xbf16>, vector<16x64xbf16>, vector<16x64xf32> -> vector<16x64xf32>
    %c64 = arith.constant 64 : index
    %c0_6 = arith.constant 0 : index
    %6 = vector.load %arg3[%c64, %c0_6] : memref<384x32xf32, #tpu.memory_space<vmem>>, vector<64x32xf32>
    %cst_7 = arith.constant dense<0.000000e+00> : vector<16x32xf32>
    %7 = tpu.matmul %5, %6, %cst_7 {dimension_numbers = #tpu.dot_dimension_numbers<[1], [0], [0], [1], [0, 0, 1, 1], [], []>} : vector<16x64xf32>, vector<64x32xf32>, vector<16x32xf32> -> vector<16x32xf32>
    %8 = arith.addf %3, %7 : vector<16x32xf32>
    %9 = arith.truncf %5 : vector<16x64xf32> to vector<16x64xbf16>
    %cst_8 = arith.constant dense<0.000000e+00> : vector<16x64xf32>
    %10 = tpu.matmul %0, %9, %cst_8 {dimension_numbers = #tpu.dot_dimension_numbers<[1], [0], [0], [1], [0, 0, 1, 1], [], []>} : vector<16x16xbf16>, vector<16x64xbf16>, vector<16x64xf32> -> vector<16x64xf32>
    %cst_9 = arith.constant 2.000000e+00 : f32
    %11 = vector.broadcast %cst_9 : f32 to vector<16x64xf32>
    %12 = arith.mulf %11, %10 : vector<16x64xf32>
    %13 = arith.subf %12, %1 : vector<16x64xf32>
    %c128 = arith.constant 128 : index
    %c0_10 = arith.constant 0 : index
    %14 = vector.load %arg3[%c128, %c0_10] : memref<384x32xf32, #tpu.memory_space<vmem>>, vector<64x32xf32>
    %cst_11 = arith.constant dense<0.000000e+00> : vector<16x32xf32>
    %15 = tpu.matmul %13, %14, %cst_11 {dimension_numbers = #tpu.dot_dimension_numbers<[1], [0], [0], [1], [0, 0, 1, 1], [], []>} : vector<16x64xf32>, vector<64x32xf32>, vector<16x32xf32> -> vector<16x32xf32>
    %16 = arith.addf %8, %15 : vector<16x32xf32>
    %17 = arith.truncf %13 : vector<16x64xf32> to vector<16x64xbf16>
    %cst_12 = arith.constant dense<0.000000e+00> : vector<16x64xf32>
    %18 = tpu.matmul %0, %17, %cst_12 {dimension_numbers = #tpu.dot_dimension_numbers<[1], [0], [0], [1], [0, 0, 1, 1], [], []>} : vector<16x16xbf16>, vector<16x64xbf16>, vector<16x64xf32> -> vector<16x64xf32>
    %cst_13 = arith.constant 2.000000e+00 : f32
    %19 = vector.broadcast %cst_13 : f32 to vector<16x64xf32>
    %20 = arith.mulf %19, %18 : vector<16x64xf32>
    %21 = arith.subf %20, %5 : vector<16x64xf32>
    %c192 = arith.constant 192 : index
    %c0_14 = arith.constant 0 : index
    %22 = vector.load %arg3[%c192, %c0_14] : memref<384x32xf32, #tpu.memory_space<vmem>>, vector<64x32xf32>
    %cst_15 = arith.constant dense<0.000000e+00> : vector<16x32xf32>
    %23 = tpu.matmul %21, %22, %cst_15 {dimension_numbers = #tpu.dot_dimension_numbers<[1], [0], [0], [1], [0, 0, 1, 1], [], []>} : vector<16x64xf32>, vector<64x32xf32>, vector<16x32xf32> -> vector<16x32xf32>
    %24 = arith.addf %16, %23 : vector<16x32xf32>
    %25 = arith.truncf %21 : vector<16x64xf32> to vector<16x64xbf16>
    %cst_16 = arith.constant dense<0.000000e+00> : vector<16x64xf32>
    %26 = tpu.matmul %0, %25, %cst_16 {dimension_numbers = #tpu.dot_dimension_numbers<[1], [0], [0], [1], [0, 0, 1, 1], [], []>} : vector<16x16xbf16>, vector<16x64xbf16>, vector<16x64xf32> -> vector<16x64xf32>
    %cst_17 = arith.constant 2.000000e+00 : f32
    %27 = vector.broadcast %cst_17 : f32 to vector<16x64xf32>
    %28 = arith.mulf %27, %26 : vector<16x64xf32>
    %29 = arith.subf %28, %13 : vector<16x64xf32>
    %c256 = arith.constant 256 : index
    %c0_18 = arith.constant 0 : index
    %30 = vector.load %arg3[%c256, %c0_18] : memref<384x32xf32, #tpu.memory_space<vmem>>, vector<64x32xf32>
    %cst_19 = arith.constant dense<0.000000e+00> : vector<16x32xf32>
    %31 = tpu.matmul %29, %30, %cst_19 {dimension_numbers = #tpu.dot_dimension_numbers<[1], [0], [0], [1], [0, 0, 1, 1], [], []>} : vector<16x64xf32>, vector<64x32xf32>, vector<16x32xf32> -> vector<16x32xf32>
    %32 = arith.addf %24, %31 : vector<16x32xf32>
    %33 = arith.truncf %29 : vector<16x64xf32> to vector<16x64xbf16>
    %cst_20 = arith.constant dense<0.000000e+00> : vector<16x64xf32>
    %34 = tpu.matmul %0, %33, %cst_20 {dimension_numbers = #tpu.dot_dimension_numbers<[1], [0], [0], [1], [0, 0, 1, 1], [], []>} : vector<16x16xbf16>, vector<16x64xbf16>, vector<16x64xf32> -> vector<16x64xf32>
    %cst_21 = arith.constant 2.000000e+00 : f32
    %35 = vector.broadcast %cst_21 : f32 to vector<16x64xf32>
    %36 = arith.mulf %35, %34 : vector<16x64xf32>
    %37 = arith.subf %36, %21 : vector<16x64xf32>
    %c320 = arith.constant 320 : index
    %c0_22 = arith.constant 0 : index
    %38 = vector.load %arg3[%c320, %c0_22] : memref<384x32xf32, #tpu.memory_space<vmem>>, vector<64x32xf32>
    %cst_23 = arith.constant dense<0.000000e+00> : vector<16x32xf32>
    %39 = tpu.matmul %37, %38, %cst_23 {dimension_numbers = #tpu.dot_dimension_numbers<[1], [0], [0], [1], [0, 0, 1, 1], [], []>} : vector<16x64xf32>, vector<64x32xf32>, vector<16x32xf32> -> vector<16x32xf32>
    %40 = arith.addf %32, %39 : vector<16x32xf32>
    %cst_24 = arith.constant 0.000000e+00 : f32
    %41 = vector.broadcast %cst_24 : f32 to vector<16x32xf32>
    %42 = arith.maximumf %40, %41 : vector<16x32xf32>
    %c0_25 = arith.constant 0 : index
    %c0_26 = arith.constant 0 : index
    %43 = vector.load %arg4[%c0_25, %c0_26] : memref<192x32xf32, #tpu.memory_space<vmem>>, vector<32x32xf32>
    %cst_27 = arith.constant dense<0.000000e+00> : vector<16x32xf32>
    %44 = tpu.matmul %42, %43, %cst_27 {dimension_numbers = #tpu.dot_dimension_numbers<[1], [0], [0], [1], [0, 0, 1, 1], [], []>} : vector<16x32xf32>, vector<32x32xf32>, vector<16x32xf32> -> vector<16x32xf32>
    %45 = arith.truncf %42 : vector<16x32xf32> to vector<16x32xbf16>
    %cst_28 = arith.constant dense<0.000000e+00> : vector<16x32xf32>
    %46 = tpu.matmul %0, %45, %cst_28 {dimension_numbers = #tpu.dot_dimension_numbers<[1], [0], [0], [1], [0, 0, 1, 1], [], []>} : vector<16x16xbf16>, vector<16x32xbf16>, vector<16x32xf32> -> vector<16x32xf32>
    %c32 = arith.constant 32 : index
    %c0_29 = arith.constant 0 : index
    %47 = vector.load %arg4[%c32, %c0_29] : memref<192x32xf32, #tpu.memory_space<vmem>>, vector<32x32xf32>
    %cst_30 = arith.constant dense<0.000000e+00> : vector<16x32xf32>
    %48 = tpu.matmul %46, %47, %cst_30 {dimension_numbers = #tpu.dot_dimension_numbers<[1], [0], [0], [1], [0, 0, 1, 1], [], []>} : vector<16x32xf32>, vector<32x32xf32>, vector<16x32xf32> -> vector<16x32xf32>
    %49 = arith.addf %44, %48 : vector<16x32xf32>
    %50 = arith.truncf %46 : vector<16x32xf32> to vector<16x32xbf16>
    %cst_31 = arith.constant dense<0.000000e+00> : vector<16x32xf32>
    %51 = tpu.matmul %0, %50, %cst_31 {dimension_numbers = #tpu.dot_dimension_numbers<[1], [0], [0], [1], [0, 0, 1, 1], [], []>} : vector<16x16xbf16>, vector<16x32xbf16>, vector<16x32xf32> -> vector<16x32xf32>
    %cst_32 = arith.constant 2.000000e+00 : f32
    %52 = vector.broadcast %cst_32 : f32 to vector<16x32xf32>
    %53 = arith.mulf %52, %51 : vector<16x32xf32>
    %54 = arith.subf %53, %42 : vector<16x32xf32>
    %c64_33 = arith.constant 64 : index
    %c0_34 = arith.constant 0 : index
    %55 = vector.load %arg4[%c64_33, %c0_34] : memref<192x32xf32, #tpu.memory_space<vmem>>, vector<32x32xf32>
    %cst_35 = arith.constant dense<0.000000e+00> : vector<16x32xf32>
    %56 = tpu.matmul %54, %55, %cst_35 {dimension_numbers = #tpu.dot_dimension_numbers<[1], [0], [0], [1], [0, 0, 1, 1], [], []>} : vector<16x32xf32>, vector<32x32xf32>, vector<16x32xf32> -> vector<16x32xf32>
    %57 = arith.addf %49, %56 : vector<16x32xf32>
    %58 = arith.truncf %54 : vector<16x32xf32> to vector<16x32xbf16>
    %cst_36 = arith.constant dense<0.000000e+00> : vector<16x32xf32>
    %59 = tpu.matmul %0, %58, %cst_36 {dimension_numbers = #tpu.dot_dimension_numbers<[1], [0], [0], [1], [0, 0, 1, 1], [], []>} : vector<16x16xbf16>, vector<16x32xbf16>, vector<16x32xf32> -> vector<16x32xf32>
    %cst_37 = arith.constant 2.000000e+00 : f32
    %60 = vector.broadcast %cst_37 : f32 to vector<16x32xf32>
    %61 = arith.mulf %60, %59 : vector<16x32xf32>
    %62 = arith.subf %61, %46 : vector<16x32xf32>
    %c96 = arith.constant 96 : index
    %c0_38 = arith.constant 0 : index
    %63 = vector.load %arg4[%c96, %c0_38] : memref<192x32xf32, #tpu.memory_space<vmem>>, vector<32x32xf32>
    %cst_39 = arith.constant dense<0.000000e+00> : vector<16x32xf32>
    %64 = tpu.matmul %62, %63, %cst_39 {dimension_numbers = #tpu.dot_dimension_numbers<[1], [0], [0], [1], [0, 0, 1, 1], [], []>} : vector<16x32xf32>, vector<32x32xf32>, vector<16x32xf32> -> vector<16x32xf32>
    %65 = arith.addf %57, %64 : vector<16x32xf32>
    %66 = arith.truncf %62 : vector<16x32xf32> to vector<16x32xbf16>
    %cst_40 = arith.constant dense<0.000000e+00> : vector<16x32xf32>
    %67 = tpu.matmul %0, %66, %cst_40 {dimension_numbers = #tpu.dot_dimension_numbers<[1], [0], [0], [1], [0, 0, 1, 1], [], []>} : vector<16x16xbf16>, vector<16x32xbf16>, vector<16x32xf32> -> vector<16x32xf32>
    %cst_41 = arith.constant 2.000000e+00 : f32
    %68 = vector.broadcast %cst_41 : f32 to vector<16x32xf32>
    %69 = arith.mulf %68, %67 : vector<16x32xf32>
    %70 = arith.subf %69, %54 : vector<16x32xf32>
    %c128_42 = arith.constant 128 : index
    %c0_43 = arith.constant 0 : index
    %71 = vector.load %arg4[%c128_42, %c0_43] : memref<192x32xf32, #tpu.memory_space<vmem>>, vector<32x32xf32>
    %cst_44 = arith.constant dense<0.000000e+00> : vector<16x32xf32>
    %72 = tpu.matmul %70, %71, %cst_44 {dimension_numbers = #tpu.dot_dimension_numbers<[1], [0], [0], [1], [0, 0, 1, 1], [], []>} : vector<16x32xf32>, vector<32x32xf32>, vector<16x32xf32> -> vector<16x32xf32>
    %73 = arith.addf %65, %72 : vector<16x32xf32>
    %74 = arith.truncf %70 : vector<16x32xf32> to vector<16x32xbf16>
    %cst_45 = arith.constant dense<0.000000e+00> : vector<16x32xf32>
    %75 = tpu.matmul %0, %74, %cst_45 {dimension_numbers = #tpu.dot_dimension_numbers<[1], [0], [0], [1], [0, 0, 1, 1], [], []>} : vector<16x16xbf16>, vector<16x32xbf16>, vector<16x32xf32> -> vector<16x32xf32>
    %cst_46 = arith.constant 2.000000e+00 : f32
    %76 = vector.broadcast %cst_46 : f32 to vector<16x32xf32>
    %77 = arith.mulf %76, %75 : vector<16x32xf32>
    %78 = arith.subf %77, %62 : vector<16x32xf32>
    %c160 = arith.constant 160 : index
    %c0_47 = arith.constant 0 : index
    %79 = vector.load %arg4[%c160, %c0_47] : memref<192x32xf32, #tpu.memory_space<vmem>>, vector<32x32xf32>
    %cst_48 = arith.constant dense<0.000000e+00> : vector<16x32xf32>
    %80 = tpu.matmul %78, %79, %cst_48 {dimension_numbers = #tpu.dot_dimension_numbers<[1], [0], [0], [1], [0, 0, 1, 1], [], []>} : vector<16x32xf32>, vector<32x32xf32>, vector<16x32xf32> -> vector<16x32xf32>
    %81 = arith.addf %73, %80 : vector<16x32xf32>
    %cst_49 = arith.constant 0.000000e+00 : f32
    %82 = vector.broadcast %cst_49 : f32 to vector<16x32xf32>
    %83 = arith.maximumf %81, %82 : vector<16x32xf32>
    %c0_50 = arith.constant 0 : index
    %c0_51 = arith.constant 0 : index
    %84 = vector.load %arg6[%c0_50, %c0_51] : memref<1x1024xf32, #tpu.memory_space<vmem>>, vector<1x1024xf32>
    %c0_52 = arith.constant 0 : index
    %c0_53 = arith.constant 0 : index
    %85 = vector.load %arg5[%c0_52, %c0_53] : memref<64x1024xf32, #tpu.memory_space<vmem>>, vector<32x1024xf32>
    %cst_54 = arith.constant dense<0.000000e+00> : vector<16x1024xf32>
    %86 = tpu.matmul %42, %85, %cst_54 {dimension_numbers = #tpu.dot_dimension_numbers<[1], [0], [0], [1], [0, 0, 1, 1], [], []>} : vector<16x32xf32>, vector<32x1024xf32>, vector<16x1024xf32> -> vector<16x1024xf32>
    %87 = vector.broadcast %84 : vector<1x1024xf32> to vector<16x1024xf32>
    %88 = arith.addf %87, %86 : vector<16x1024xf32>
    %c32_55 = arith.constant 32 : index
    %c0_56 = arith.constant 0 : index
    %89 = vector.load %arg5[%c32_55, %c0_56] : memref<64x1024xf32, #tpu.memory_space<vmem>>, vector<32x1024xf32>
    %cst_57 = arith.constant dense<0.000000e+00> : vector<16x1024xf32>
    %90 = tpu.matmul %83, %89, %cst_57 {dimension_numbers = #tpu.dot_dimension_numbers<[1], [0], [0], [1], [0, 0, 1, 1], [], []>} : vector<16x32xf32>, vector<32x1024xf32>, vector<16x1024xf32> -> vector<16x1024xf32>
    %91 = arith.addf %88, %90 : vector<16x1024xf32>
    %cst_58 = arith.constant 0.000000e+00 : f32
    %92 = vector.broadcast %cst_58 : f32 to vector<16x1024xf32>
    %93 = arith.maximumf %91, %92 : vector<16x1024xf32>
    %c0_59 = arith.constant 0 : index
    %c0_60 = arith.constant 0 : index
    %94 = vector.load %arg7[%c0_59, %c0_60] : memref<1x1024xf32, #tpu.memory_space<vmem>>, vector<1x1024xf32>
    %95 = vector.broadcast %94 : vector<1x1024xf32> to vector<16x1024xf32>
    %96 = arith.mulf %93, %95 : vector<16x1024xf32>
    %c0_61 = arith.constant 0 : index
    %c0_62 = arith.constant 0 : index
    %97 = vector.load %arg8[%c0_61, %c0_62] : memref<1x1024xf32, #tpu.memory_space<vmem>>, vector<1x1024xf32>
    %98 = vector.broadcast %97 : vector<1x1024xf32> to vector<16x1024xf32>
    %99 = arith.addf %96, %98 : vector<16x1024xf32>
    %c0_63 = arith.constant 0 : index
    %c0_64 = arith.constant 0 : index
    %100 = vector.load %arg9[%c0_63, %c0_64] : memref<1024x128xf32, #tpu.memory_space<vmem>>, vector<1024x128xf32>
    %cst_65 = arith.constant dense<0.000000e+00> : vector<16x128xf32>
    %101 = tpu.matmul %99, %100, %cst_65 {dimension_numbers = #tpu.dot_dimension_numbers<[1], [0], [0], [1], [0, 0, 1, 1], [], []>} : vector<16x1024xf32>, vector<1024x128xf32>, vector<16x128xf32> -> vector<16x128xf32>
    %c0_66 = arith.constant 0 : index
    %c0_67 = arith.constant 0 : index
    %102 = vector.load %arg10[%c0_66, %c0_67] : memref<1x128xf32, #tpu.memory_space<vmem>>, vector<1x128xf32>
    %103 = vector.broadcast %102 : vector<1x128xf32> to vector<16x128xf32>
    %104 = arith.addf %101, %103 : vector<16x128xf32>
    %c0_68 = arith.constant 0 : index
    %c0_69 = arith.constant 0 : index
    %105 = vector.load %arg17[%c0_68, %c0_69] : memref<16x128xf32, #tpu.memory_space<vmem>>, vector<16x128xf32>
    tpu.vector_store %arg17[%c0_68, %c0_69], %104 {strides = array<i32>} : memref<16x128xf32, #tpu.memory_space<vmem>>, vector<16x128xf32>,
    %c0_70 = arith.constant 0 : index
    %c0_71 = arith.constant 0 : index
    %106 = vector.load %arg11[%c0_70, %c0_71] : memref<128x256xf32, #tpu.memory_space<vmem>>, vector<128x256xf32>
    %cst_72 = arith.constant dense<0.000000e+00> : vector<16x256xf32>
    %107 = tpu.matmul %104, %106, %cst_72 {dimension_numbers = #tpu.dot_dimension_numbers<[1], [0], [0], [1], [0, 0, 1, 1], [], []>} : vector<16x128xf32>, vector<128x256xf32>, vector<16x256xf32> -> vector<16x256xf32>
    %c0_73 = arith.constant 0 : index
    %c0_74 = arith.constant 0 : index
    %108 = vector.load %arg12[%c0_73, %c0_74] : memref<1x256xf32, #tpu.memory_space<vmem>>, vector<1x256xf32>
    %109 = vector.broadcast %108 : vector<1x256xf32> to vector<16x256xf32>
    %110 = arith.addf %107, %109 : vector<16x256xf32>
    %cst_75 = arith.constant 0.000000e+00 : f32
    %111 = vector.broadcast %cst_75 : f32 to vector<16x256xf32>
    %112 = arith.maximumf %110, %111 : vector<16x256xf32>
    %c0_76 = arith.constant 0 : index
    %c0_77 = arith.constant 0 : index
    %113 = vector.load %arg13[%c0_76, %c0_77] : memref<1x256xf32, #tpu.memory_space<vmem>>, vector<1x256xf32>
    %114 = vector.broadcast %113 : vector<1x256xf32> to vector<16x256xf32>
    %115 = arith.mulf %112, %114 : vector<16x256xf32>
    %c0_78 = arith.constant 0 : index
    %c0_79 = arith.constant 0 : index
    %116 = vector.load %arg14[%c0_78, %c0_79] : memref<1x256xf32, #tpu.memory_space<vmem>>, vector<1x256xf32>
    %117 = vector.broadcast %116 : vector<1x256xf32> to vector<16x256xf32>
    %118 = arith.addf %115, %117 : vector<16x256xf32>
    %c0_80 = arith.constant 0 : index
    %c0_81 = arith.constant 0 : index
    %119 = vector.load %arg15[%c0_80, %c0_81] : memref<256x128xf32, #tpu.memory_space<vmem>>, vector<256x128xf32>
    %cst_82 = arith.constant dense<0.000000e+00> : vector<16x128xf32>
    %120 = tpu.matmul %118, %119, %cst_82 {dimension_numbers = #tpu.dot_dimension_numbers<[1], [0], [0], [1], [0, 0, 1, 1], [], []>} : vector<16x256xf32>, vector<256x128xf32>, vector<16x128xf32> -> vector<16x128xf32>
    %c0_83 = arith.constant 0 : index
    %c0_84 = arith.constant 0 : index
    %121 = vector.load %arg16[%c0_83, %c0_84] : memref<1x128xf32, #tpu.memory_space<vmem>>, vector<1x128xf32>
    %122 = vector.broadcast %121 : vector<1x128xf32> to vector<16x128xf32>
    %123 = arith.addf %120, %122 : vector<16x128xf32>
    %c0_85 = arith.constant 0 : index
    %c0_86 = arith.constant 0 : index
    %124 = vector.load %arg18[%c0_85, %c0_86] : memref<16x128xf32, #tpu.memory_space<vmem>>, vector<16x128xf32>
    tpu.vector_store %arg18[%c0_85, %c0_86], %123 {strides = array<i32>} : memref<16x128xf32, #tpu.memory_space<vmem>>, vector<16x128xf32>,
    return
  }
  func.func @transform_0(%arg0: i32) -> (i32, i32) {
    %c0_i32 = arith.constant 0 : i32
    %c0_i32_0 = arith.constant 0 : i32
    %c0_i32_1 = arith.constant 0 : i32
    return %c0_i32, %c0_i32_0 : i32, i32
  }
  func.func @transform_1(%arg0: i32) -> (i32, i32) {
    %c0_i32 = arith.constant 0 : i32
    %c0_i32_0 = arith.constant 0 : i32
    %c0_i32_1 = arith.constant 0 : i32
    return %c0_i32, %c0_i32_0 : i32, i32
  }
  func.func @transform_2(%arg0: i32) -> (i32, i32) {
    %c0_i32 = arith.constant 0 : i32
    %c0_i32_0 = arith.constant 0 : i32
    %c0_i32_1 = arith.constant 0 : i32
    return %c0_i32, %c0_i32_0 : i32, i32
  }
  func.func @transform_3(%arg0: i32) -> (i32, i32) {
    %c0_i32 = arith.constant 0 : i32
    %c0_i32_0 = arith.constant 0 : i32
    %c0_i32_1 = arith.constant 0 : i32
    return %c0_i32, %c0_i32_0 : i32, i32
  }
  func.func @transform_4(%arg0: i32) -> (i32, i32) {
    %c0_i32 = arith.constant 0 : i32
    %c0_i32_0 = arith.constant 0 : i32
    %c0_i32_1 = arith.constant 0 : i32
    return %c0_i32, %c0_i32_0 : i32, i32
  }
  func.func @transform_5(%arg0: i32) -> (i32, i32) {
    %c0_i32 = arith.constant 0 : i32
    %c0_i32_0 = arith.constant 0 : i32
    %c0_i32_1 = arith.constant 0 : i32
    return %c0_i32, %c0_i32_0 : i32, i32
  }
  func.func @transform_6(%arg0: i32) -> (i32, i32) {
    %c0_i32 = arith.constant 0 : i32
    %c0_i32_0 = arith.constant 0 : i32
    %c0_i32_1 = arith.constant 0 : i32
    return %c0_i32, %c0_i32_0 : i32, i32
  }
  func.func @transform_7(%arg0: i32) -> (i32, i32) {
    %c0_i32 = arith.constant 0 : i32
    %c0_i32_0 = arith.constant 0 : i32
    %c0_i32_1 = arith.constant 0 : i32
    return %c0_i32, %c0_i32_0 : i32, i32
  }
  func.func @transform_8(%arg0: i32) -> (i32, i32) {
    %c0_i32 = arith.constant 0 : i32
    %c0_i32_0 = arith.constant 0 : i32
    %c0_i32_1 = arith.constant 0 : i32
    return %c0_i32, %c0_i32_0 : i32, i32
  }
  func.func @transform_9(%arg0: i32) -> (i32, i32) {
    %c0_i32 = arith.constant 0 : i32
    %c0_i32_0 = arith.constant 0 : i32
    %c0_i32_1 = arith.constant 0 : i32
    return %c0_i32, %c0_i32_0 : i32, i32
  }
  func.func @transform_10(%arg0: i32) -> (i32, i32) {
    %c0_i32 = arith.constant 0 : i32
    %c0_i32_0 = arith.constant 0 : i32
    %c0_i32_1 = arith.constant 0 : i32
    return %c0_i32, %c0_i32_0 : i32, i32
  }
  func.func @transform_11(%arg0: i32) -> (i32, i32) {
    %c0_i32 = arith.constant 0 : i32
    %c0_i32_0 = arith.constant 0 : i32
    %c0_i32_1 = arith.constant 0 : i32
    return %c0_i32, %c0_i32_0 : i32, i32
  }
  func.func @transform_12(%arg0: i32) -> (i32, i32) {
    %c0_i32 = arith.constant 0 : i32
    %c0_i32_0 = arith.constant 0 : i32
    %c0_i32_1 = arith.constant 0 : i32
    return %c0_i32, %c0_i32_0 : i32, i32
  }
  func.func @transform_13(%arg0: i32) -> (i32, i32) {
    %c0_i32 = arith.constant 0 : i32
    %c0_i32_0 = arith.constant 0 : i32
    %c0_i32_1 = arith.constant 0 : i32
    return %c0_i32, %c0_i32_0 : i32, i32
  }
  func.func @transform_14(%arg0: i32) -> (i32, i32) {
    %c0_i32 = arith.constant 0 : i32
    %c0_i32_0 = arith.constant 0 : i32
    %c0_i32_1 = arith.constant 0 : i32
    return %c0_i32, %c0_i32_0 : i32, i32
  }
  func.func @transform_15(%arg0: i32) -> (i32, i32) {
    %c0_i32 = arith.constant 0 : i32
    %c0_i32_0 = arith.constant 0 : i32
    %c0_i32_1 = arith.constant 0 : i32
    return %c0_i32, %c0_i32_0 : i32, i32
  }
  func.func @transform_16(%arg0: i32) -> (i32, i32) {
    %c0_i32 = arith.constant 0 : i32
    %c0_i32_0 = arith.constant 0 : i32
    %c0_i32_1 = arith.constant 0 : i32
    return %c0_i32, %c0_i32_0 : i32, i32
  }
  func.func @transform_17(%arg0: i32) -> (i32, i32) {
    %c0_i32 = arith.constant 0 : i32
    %c0_i32_0 = arith.constant 0 : i32
    %c0_i32_1 = arith.constant 0 : i32
    return %c0_i32, %c0_i32_0 : i32, i32
  }
}

</mosaic_0001>

<bundles_post_ra>
// kernel: _lambda_.1
= control target key start
LH: loop header
LB: loop body
LE: loop exit
PB: predicated region body
PF: predicated region fallthrough
CT: control target
= control target key end

     0   :  { %v4251_v0 = vmov 0.0   ;;  %vm4252_vm0 = vmmov 0   ;;  %vm74_vm1 = vcmask 130048   ;;  %vm127_vm2 = vcmask 523264   ;;  %s5689_s1 = inlined_call_operand.vmem [shape: f32[16,64], index: 1, kind: input, shape index: {}]   ;;  %s5690_s0 = inlined_call_operand.vmem [shape: bf16[16,16], index: 0, kind: input, shape index: {}]   ;;  %s5691_s2 = inlined_call_operand.vmem [shape: f32[384,32], index: 2, kind: input, shape index: {}]   ;;  %s5692_s4 = inlined_call_operand.vmem [shape: f32[64,1024], index: 4, kind: input, shape index: {}]   ;;  %s5693_s3 = inlined_call_operand.vmem [shape: f32[192,32], index: 3, kind: input, shape index: {}]   ;;  %s5694_s8 = inlined_call_operand.vmem [shape: f32[1024,128], index: 8, kind: input, shape index: {}]   ;;  %s5695_s5 = inlined_call_operand.vmem [shape: f32[1,1024], index: 5, kind: input, shape index: {}]   ;;  %s5696_s6 = inlined_call_operand.vmem [shape: f32[1,1024], index: 6, kind: input, shape index: {}]   ;;  %s5697_s7 = inlined_call_operand.vmem [shape: f32[1,1024], index: 7, kind: input, shape index: {}]   ;;  %s5698_s10 = inlined_call_operand.vmem [shape: f32[128,256], index: 10, kind: input, shape index: {}]   ;;  %s5699_s14 = inlined_call_operand.vmem [shape: f32[256,128], index: 14, kind: input, shape index: {}]   ;;  %s5700_s9 = inlined_call_operand.vmem [shape: f32[1,128], index: 9, kind: input, shape index: {}]   ;;  %s5701_s16 = inlined_call_operand.vmem [shape: f32[16,128], index: 16, kind: output, shape index: {0}]   ;;  %s5702_s11 = inlined_call_operand.vmem [shape: f32[1,256], index: 11, kind: input, shape index: {}]   ;;  %s5703_s12 = inlined_call_operand.vmem [shape: f32[1,256], index: 12, kind: input, shape index: {}]   ;;  %s5704_s13 = inlined_call_operand.vmem [shape: f32[1,256], index: 13, kind: input, shape index: {}]   ;;  %s5705_s15 = inlined_call_operand.vmem [shape: f32[1,128], index: 15, kind: input, shape index: {}]   ;;  %s5706_s17 = inlined_call_operand.vmem [shape: f32[16,128], index: 17, kind: output, shape index: {1}]  }
   0x1   :  { %5708 = sst [smem:[#allocation2_spill]] %s5689_s1  ;;  %3556 = vmatprep.subr.bf16.mxu1 %v4251_v0  ;;  %3558 = vmatprep.mubr.msk.bf16.mxu1 %vm4252_vm0, %v4251_v0  ;;  %v119_v5 = vld [vmem:[%s5691_s2 + $0x40] sm:$0xff]  ;;  %v120_v6 = vld [vmem:[%s5691_s2 + $0x48] sm:$0xff]  ;;  %v121_v7 = vld [vmem:[%s5691_s2 + $0x50] sm:$0xff]  ;;  %vm890_vm3 = vcmask 261120  }
   0x2   :  { %5709 = sst [smem:[#allocation3_spill]] %s5690_s0  ;;  %s5710_s26 = sld [smem:[#allocation2_spill]]  ;;  %v122_v8 = vld [vmem:[%s5691_s2 + $0x58] sm:$0xff]  ;;  %v3796_v9 = vpack.c.bf16 %v120_v6, %v119_v5  ;;  %v123_v11 = vld [vmem:[%s5691_s2 + $0x60] sm:$0xff]  ;;  %v124_v12 = vld [vmem:[%s5691_s2 + $0x68] sm:$0xff] }
   0x3   :  { %s5711_s30 = sld [smem:[#allocation3_spill]]  ;;  %v3800_v10 = vpack.c.bf16 %v122_v8, %v121_v7  ;;  %v3804_v13 = vpack.c.bf16 %v124_v12, %v123_v11  ;;  %v125_v14 = vld [vmem:[%s5691_s2 + $0x70] sm:$0xff]  ;;  %v126_v15 = vld [vmem:[%s5691_s2 + $0x78] sm:$0xff]  ;;  %v60_v17 = vld [vmem:[%s5691_s2] sm:$0xff] }
   0x4   :  { %3797 = vmatprep.subr.bf16.mxu0 %v3796_v9  ;;  %v3808_v16 = vpack.c.bf16 %v126_v15, %v125_v14  ;;  %v61_v18 = vld [vmem:[%s5691_s2 + $0x8] sm:$0xff]  ;;  %v62_v19 = vld [vmem:[%s5691_s2 + $0x10] sm:$0xff]  ;;  %v63_v21 = vld [vmem:[%s5691_s2 + $0x18] sm:$0xff] }
   0x5   :  { %3799 = vmatpush3.bf16.msra.mxu0 %v3796_v9  ;;  %v3812_v20 = vpack.c.bf16 %v61_v18, %v60_v17  ;;  %v3816_v22 = vpack.c.bf16 %v63_v21, %v62_v19  ;;  %v64_v23 = vld [vmem:[%s5691_s2 + $0x20] sm:$0xff]  ;;  %v65_v24 = vld [vmem:[%s5691_s2 + $0x28] sm:$0xff]  ;;  %v66_v26 = vld [vmem:[%s5691_s2 + $0x30] sm:$0xff] }
   0x6   :  { %3801 = vmatprep.subr.bf16.mxu0 %v3800_v10  ;;  %v3820_v25 = vpack.c.bf16 %v65_v24, %v64_v23  ;;  %v67_v27 = vld [vmem:[%s5691_s2 + $0x38] sm:$0xff]  ;;  %v336_v29 = vld [vmem:[%s5691_s2 + $0x80] sm:$0xff]  ;;  %v337_v30 = vld [vmem:[%s5691_s2 + $0x88] sm:$0xff] }
   0x7   :  { %v3824_v28 = vpack.c.bf16 %v67_v27, %v66_v26  ;;  %v3828_v31 = vpack.c.bf16 %v337_v30, %v336_v29  ;;  %v338_v37 = vld [vmem:[%s5691_s2 + $0x90] sm:$0xff]  ;;  %v339_v38 = vld [vmem:[%s5691_s2 + $0x98] sm:$0xff]  ;;  %v340_v40 = vld [vmem:[%s5691_s2 + $0xa0] sm:$0xff] }
   0x8   :  { %v4347_v1 = vld [vmem:[%s5710_s26] sm:$0xff]  ;;  %v4352_v2 = vld [vmem:[%s5710_s26 + $0x8] sm:$0xff]  ;;  %v3832_v39 = vpack.c.bf16 %v339_v38, %v338_v37  ;;  %v342_v43 = vld [vmem:[%s5691_s2 + $0xb0] sm:$0xff] }
   0x9   :  { %v68_v3 = vpack.c.bf16 %v4352_v2, %v4347_v1  ;;  %v4361_v4 = vld [vmem:[%s5711_s30] sm:$0xff]   ;;  %3803 = vmatpush3.bf16.msra.mxu0 %v3800_v10  ;;  %v341_v41 = vld [vmem:[%s5691_s2 + $0xa8] sm:$0xff]  ;;  %v343_v44 = vld [vmem:[%s5691_s2 + $0xb8] sm:$0xff] }
   0xa   :  { %3805 = vmatprep.subr.bf16.mxu0 %v3804_v13  ;;  %v3836_v42 = vpack.c.bf16 %v341_v41, %v340_v40  ;;  %v3840_v45 = vpack.c.bf16 %v343_v44, %v342_v43  ;;  %v473_v46 = vld [vmem:[%s5691_s2 + $0xc0] sm:$0xff]  ;;  %v474_v47 = vld [vmem:[%s5691_s2 + $0xc8] sm:$0xff]  ;;  %v475_v55 = vld [vmem:[%s5691_s2 + $0xd0] sm:$0xff] }
   0xb   :  { %3557 = vmatpush3.bf16.msra.mxu1 %v68_v3  ;;  %v3844_v48 = vpack.c.bf16 %v474_v47, %v473_v46  ;;  %v476_v56 = vld [vmem:[%s5691_s2 + $0xd8] sm:$0xff]  ;;  %v477_v62 = vld [vmem:[%s5691_s2 + $0xe0] sm:$0xff]  ;;  %v478_v63 = vld [vmem:[%s5691_s2 + $0xe8] sm:$0xff] }
   0xc   :  { %3813 = vmatprep.subr.bf16.mxu1 %v3812_v20  ;;  %v3848_v61 = vpack.c.bf16 %v476_v56, %v475_v55  ;;  %v479_v3 = vld [vmem:[%s5691_s2 + $0xf0] sm:$0xff]  ;;  %v480_v5 = vld [vmem:[%s5691_s2 + $0xf8] sm:$0xff]  ;;  %v610_v7 = vld [vmem:[%s5691_s2 + $0x100] sm:$0xff] }
   0xd   :  { %3807 = vmatpush3.bf16.msra.mxu0 %v3804_v13  ;;  %v3856_v6 = vpack.c.bf16 %v480_v5, %v479_v3  ;;  %v611_v8 = vld [vmem:[%s5691_s2 + $0x108] sm:$0xff]  ;;  %v612_v14 = vld [vmem:[%s5691_s2 + $0x110] sm:$0xff]  ;;  %v613_v15 = vld [vmem:[%s5691_s2 + $0x118] sm:$0xff] }
   0xe   :  { %3559 = vmatmul.mubr.msk.bf16.vlgmr.msra.gmra.mrb[0].mxu1 %vm74_vm1, %v4361_v4  ;;  %3809 = vmatprep.subr.bf16.mxu0 %v3808_v16  ;;  %v3860_v9 = vpack.c.bf16 %v611_v8, %v610_v7  ;;  %v614_v21 = vld [vmem:[%s5691_s2 + $0x120] sm:$0xff]  ;;  %v617_v26 = vld [vmem:[%s5691_s2 + $0x138] sm:$0xff]  ;;  %v748_v29 = vld [vmem:[%s5691_s2 + $0x148] sm:$0xff] }
   0xf   :  { %3597 = vmatprep.mubr.msk.f32.mxu1 %vm127_vm2, %v4347_v1  ;;  %3815 = vmatpush3.bf16.msra.mxu1 %v3812_v20  ;;  %v3864_v20 = vpack.c.bf16 %v613_v15, %v612_v14  ;;  %v752_v43 = vld [vmem:[%s5691_s2 + $0x168] sm:$0xff]  ;;  %v753_v46 = vld [vmem:[%s5691_s2 + $0x170] sm:$0xff]  ;;  %v754_v47 = vld [vmem:[%s5691_s2 + $0x178] sm:$0xff] }
  0x10   :  { %3817 = vmatprep.subr.bf16.mxu1 %v3816_v22  ;;  %v1613_v3 = vld [vmem:[%s5692_s4 + $0xc8] sm:$0xff]  ;;  %v1612_v7 = vld [vmem:[%s5692_s4 + $0xc0] sm:$0xff]  ;;  %v1598_v14 = vld [vmem:[%s5692_s4 + $0x50] sm:$0xff] }
  0x11   :  { %3811 = vmatpush3.bf16.msra.mxu0 %v3808_v16 }
  0x12   :  { %3600 = vmatprep.subr.bf16.mxu0 %v4251_v0 }
  0x13   :  { %3819 = vmatpush3.bf16.msra.mxu1 %v3816_v22  ;;  %v615_v22 = vld [vmem:[%s5691_s2 + $0x128] sm:$0xff] }
  0x14   :  { %3821 = vmatprep.subr.bf16.mxu1 %v3820_v25  ;;  %v3868_v24 = vpack.c.bf16 %v615_v22, %v614_v21  ;;  %v887_v21 = vld [vmem:[%s5693_s3 + $0x28] sm:$0xff] }
  0x17   :  { %3823 = vmatpush3.bf16.msra.mxu1 %v3820_v25  ;;  %v616_v25 = vld [vmem:[%s5691_s2 + $0x130] sm:$0xff] }
  0x18   :  { %3825 = vmatprep.subr.bf16.mxu1 %v3824_v28  ;;  %v3872_v27 = vpack.c.bf16 %v617_v26, %v616_v25  ;;  %v1606_v25 = vld [vmem:[%s5692_s4 + $0x90] sm:$0xff]  ;;  %v1595_v26 = vld [vmem:[%s5692_s4 + $0x38] sm:$0xff] }
  0x1b   :  { %3827 = vmatpush3.bf16.msra.mxu1 %v3824_v28  ;;  %v747_v28 = vld [vmem:[%s5691_s2 + $0x140] sm:$0xff] }
  0x1c   :  { %3829 = vmatprep.subr.bf16.mxu1 %v3828_v31  ;;  %v3876_v30 = vpack.c.bf16 %v748_v29, %v747_v28 }
  0x1e   :  { %3598 = vmatmul.mubr.msk.f32.vlgmr.msra.gmra.mrb[4].mxu1 %vm127_vm2, %v4352_v2 }
  0x1f   :  { %3831 = vmatpush3.bf16.msra.mxu1 %v3828_v31 }
  0x20   :  { %3833 = vmatprep.subr.bf16.mxu1 %v3832_v39 }
  0x23   :  { %3835 = vmatpush3.bf16.msra.mxu1 %v3832_v39 }
  0x24   :  { %3837 = vmatprep.subr.bf16.mxu1 %v3836_v42 }
  0x27   :  { %3839 = vmatpush3.bf16.msra.mxu1 %v3836_v42  ;;  %v751_v42 = vld [vmem:[%s5691_s2 + $0x160] sm:$0xff] }
  0x28   :  { %3841 = vmatprep.subr.bf16.mxu1 %v3840_v45 }
  0x2b   :  { %3843 = vmatpush3.bf16.msra.mxu1 %v3840_v45  ;;  %v3884_v45 = vpack.c.bf16 %v752_v43, %v751_v42  ;;  %v1618_v42 = vld [vmem:[%s5692_s4 + $0xf0] sm:$0xff] }
  0x2c   :  { %3845 = vmatprep.subr.bf16.mxu1 %v3844_v48 }
  0xe1   :  { %v4424_v32 = vpop.f32.mrb[0].mxu1 }
  0xe2   :  { %v3560_v33 = vpop.f32.mrb[1].mxu1  ;;  %3578 = vmatprep.mubr.msk.f32.mxu0 %vm127_vm2, %v4424_v32 }
  0xe3   :  { %v4428_v34 = vpop.f32.mrb[2].mxu1 }
  0xe4   :  { %v290_v35 = vpack.c.bf16 %v4428_v34, %v4424_v32  ;;  %v3561_v36 = vpop.f32.mrb[3].mxu1  ;;  %3579 = vmatmul.mubr.msk.f32.vlgmr.msra.gmra.mrb[0].mxu0 %vm127_vm2, %v4428_v34 }
  0xe5   :  { %3602 = vmatprep.mubr.msk.bf16.mxu0 %vm4252_vm0, %v4251_v0  ;;  %v750_v36 = vld [vmem:[%s5691_s2 + $0x158] sm:$0xff] }
  0xe6   :  { %3601 = vmatpush3.bf16.msra.mxu0 %v290_v35  ;;  %v749_v35 = vld [vmem:[%s5691_s2 + $0x150] sm:$0xff] }
  0xe7   :  { %3625 = vmatprep.subr.bf16.mxu0 %v4251_v0  ;;  %v3880_v41 = vpack.c.bf16 %v750_v36, %v749_v35  ;;  %v1602_v35 = vld [vmem:[%s5692_s4 + $0x70] sm:$0xff]  ;;  %v1611_v36 = vld [vmem:[%s5692_s4 + $0xb8] sm:$0xff] }
  0xe9   :  { %3603 = vmatmul.mubr.msk.bf16.vlgmr.msra.gmra.mrb[4].mxu0 %vm74_vm1, %v4361_v4 }
  0xea   :  { %3627 = vmatprep.mubr.msk.bf16.mxu0 %vm4252_vm0, %v4251_v0 }
 0x1b7   :  { %v4465_v49 = vpop.f32.mrb[0].mxu0 }
 0x1b8   :  { %v4467_v50 = vpop.f32.mrb[1].mxu0 }
 0x1bc   :  { %v325_v51 = vpop.f32.mrb[4].mxu0 }
 0x1bd   :  { %v332_v52 = vmul.f32 2.0, %v325_v51  ;;  %v3604_v53 = vpop.f32.mrb[5].mxu0  ;;  %v1589_v51 = vld [vmem:[%s5692_s4 + $0x8] sm:$0xff] }
 0x1be   :  { %v328_v54 = vpop.f32.mrb[6].mxu0 }
 0x1bf   :  { %v4476_v57 = vsub.f32 %v332_v52, %v4347_v1  ;;  %v333_v58 = vmul.f32 2.0, %v328_v54  ;;  %v3605_v59 = vpop.f32.mrb[7].mxu0  ;;  %v1597_v52 = vld [vmem:[%s5692_s4 + $0x48] sm:$0xff] }
 0x1c0   :  { %v3940_v53 = vpack.c.bf16 %v1597_v52, %v1589_v51 }
 0x1c1   :  { %v4479_v60 = vsub.f32 %v333_v58, %v4352_v2  ;;  %3622 = vmatprep.mubr.msk.f32.mxu1 %vm127_vm2, %v4476_v57  ;;  %v3852_v2 = vpack.c.bf16 %v478_v63, %v477_v62  ;;  %v1596_v58 = vld [vmem:[%s5692_s4 + $0x40] sm:$0xff] }
 0x1c3   :  { %v427_v1 = vpack.c.bf16 %v4479_v60, %v4476_v57  ;;  %3623 = vmatmul.mubr.msk.f32.vlgmr.msra.gmra.mrb[4].mxu1 %vm127_vm2, %v4479_v60 }
 0x1c4   :  { %3847 = vmatpush3.bf16.msra.mxu1 %v3844_v48  ;;  %v3888_v48 = vpack.c.bf16 %v754_v47, %v753_v46  ;;  %v842_v47 = vld [vmem:[%s5693_s3 + $0x10] sm:$0xff] }
 0x1c5   :  { %3626 = vmatpush3.bf16.msra.mxu0 %v427_v1  ;;  %3849 = vmatprep.subr.bf16.mxu1 %v3848_v61 }
 0x1c6   :  { %3650 = vmatprep.subr.bf16.mxu0 %v4251_v0 }
 0x1c8   :  { %3628 = vmatmul.mubr.msk.bf16.vlgmr.msra.gmra.mrb[8].mxu0 %vm74_vm1, %v4361_v4  ;;  %3851 = vmatpush3.bf16.msra.mxu1 %v3848_v61 }
 0x1c9   :  { %3853 = vmatprep.subr.bf16.mxu1 %v3852_v2  ;;  %3652 = vmatprep.mubr.msk.bf16.mxu0 %vm4252_vm0, %v4251_v0 }
 0x1cc   :  { %3855 = vmatpush3.bf16.msra.mxu1 %v3852_v2  ;;  %v1605_v2 = vld [vmem:[%s5692_s4 + $0x88] sm:$0xff] }
 0x1cd   :  { %3857 = vmatprep.subr.bf16.mxu1 %v3856_v6  ;;  %v3944_v5 = vpack.c.bf16 %v1613_v3, %v1605_v2 }
 0x1d0   :  { %3859 = vmatpush3.bf16.msra.mxu1 %v3856_v6  ;;  %v1604_v6 = vld [vmem:[%s5692_s4 + $0x80] sm:$0xff] }
 0x1d1   :  { %3861 = vmatprep.subr.bf16.mxu1 %v3860_v9  ;;  %v3946_v8 = vpack.c.bf16 %v1612_v7, %v1604_v6 }
 0x29b   :  { %v462_v10 = vpop.f32.mrb[8].mxu0 }
 0x29c   :  { %v469_v11 = vmul.f32 2.0, %v462_v10  ;;  %v3629_v12 = vpop.f32.mrb[9].mxu0  ;;  %v1599_v10 = vld [vmem:[%s5692_s4 + $0x58] sm:$0xff] }
 0x29d   :  { %v465_v13 = vpop.f32.mrb[10].mxu0 }
 0x29e   :  { %v4517_v16 = vsub.f32 %v469_v11, %v4424_v32  ;;  %v470_v17 = vmul.f32 2.0, %v465_v13  ;;  %v3630_v18 = vpop.f32.mrb[11].mxu0  ;;  %v1590_v13 = vld [vmem:[%s5692_s4 + $0x10] sm:$0xff] }
 0x29f   :  { %v1615_v18 = vld [vmem:[%s5692_s4 + $0xd8] sm:$0xff]  ;;  %v3950_v22 = vpack.c.bf16 %v1598_v14, %v1590_v13  ;;  %v1234_v13 = vld [vmem:[%s5693_s3 + $0x70] sm:$0xff] }
 0x2a0   :  { %v4520_v19 = vsub.f32 %v470_v17, %v4428_v34  ;;  %3647 = vmatprep.mubr.msk.f32.mxu1 %vm127_vm2, %v4517_v16  ;;  %v1607_v17 = vld [vmem:[%s5692_s4 + $0x98] sm:$0xff] }
 0x2a1   :  { %v1235_v14 = vld [vmem:[%s5693_s3 + $0x78] sm:$0xff] }
 0x2a2   :  { %v564_v23 = vpack.c.bf16 %v4520_v19, %v4517_v16  ;;  %3648 = vmatmul.mubr.msk.f32.vlgmr.msra.gmra.mrb[4].mxu1 %vm127_vm2, %v4520_v19 }
 0x2a3   :  { %3863 = vmatpush3.bf16.msra.mxu1 %v3860_v9  ;;  %v1591_v9 = vld [vmem:[%s5692_s4 + $0x18] sm:$0xff] }
 0x2a4   :  { %3651 = vmatpush3.bf16.msra.mxu0 %v564_v23  ;;  %3865 = vmatprep.subr.bf16.mxu1 %v3864_v20  ;;  %v3948_v11 = vpack.c.bf16 %v1599_v10, %v1591_v9  ;;  %v1233_v9 = vld [vmem:[%s5693_s3 + $0x68] sm:$0xff] }
 0x2a5   :  { %3675 = vmatprep.subr.bf16.mxu0 %v4251_v0 }
 0x2a7   :  { %3653 = vmatmul.mubr.msk.bf16.vlgmr.msra.gmra.mrb[12].mxu0 %vm74_vm1, %v4361_v4  ;;  %3867 = vmatpush3.bf16.msra.mxu1 %v3864_v20  ;;  %v886_v20 = vld [vmem:[%s5693_s3 + $0x20] sm:$0xff] }
 0x2a8   :  { %3869 = vmatprep.subr.bf16.mxu1 %v3868_v24  ;;  %3677 = vmatprep.mubr.msk.bf16.mxu0 %vm4252_vm0, %v4251_v0  ;;  %v3892_v28 = vpack.c.bf16 %v887_v21, %v886_v20 }
 0x2ab   :  { %3871 = vmatpush3.bf16.msra.mxu1 %v3868_v24  ;;  %v3952_v24 = vpack.c.bf16 %v1615_v18, %v1607_v17 }
 0x2ac   :  { %3873 = vmatprep.subr.bf16.mxu1 %v3872_v27 }
 0x2af   :  { %3875 = vmatpush3.bf16.msra.mxu1 %v3872_v27  ;;  %v1603_v27 = vld [vmem:[%s5692_s4 + $0x78] sm:$0xff] }
 0x2b0   :  { %3877 = vmatprep.subr.bf16.mxu1 %v3876_v30 }
 0x37a   :  { %v599_v31 = vpop.f32.mrb[12].mxu0 }
 0x37b   :  { %v606_v32 = vmul.f32 2.0, %v599_v31  ;;  %v3654_v33 = vpop.f32.mrb[13].mxu0  ;;  %v888_v31 = vld [vmem:[%s5693_s3 + $0x30] sm:$0xff] }
 0x37c   :  { %v602_v34 = vpop.f32.mrb[14].mxu0  ;;  %v3964_v33 = vpack.c.bf16 %v1603_v27, %v1595_v26 }
 0x37d   :  { %v608_v37 = vsub.f32 %v606_v32, %v4476_v57  ;;  %v607_v38 = vmul.f32 2.0, %v602_v34  ;;  %v3655_v39 = vpop.f32.mrb[15].mxu0  ;;  %v1588_v57 = vld [vmem:[%s5692_s4] sm:$0xff]  ;;  %v889_v32 = vld [vmem:[%s5693_s3 + $0x38] sm:$0xff]  ;;  %v1594_v34 = vld [vmem:[%s5692_s4 + $0x30] sm:$0xff] }
 0x37e   :  { %v3942_v63 = vpack.c.bf16 %v1596_v58, %v1588_v57  ;;  %v3966_v39 = vpack.c.bf16 %v1602_v35, %v1594_v34  ;;  %v1099_v57 = vld [vmem:[%s5693_s3 + $0x40] sm:$0xff]  ;;  %v1100_v58 = vld [vmem:[%s5693_s3 + $0x48] sm:$0xff] }
 0x37f   :  { %v609_v40 = vsub.f32 %v607_v38, %v4479_v60  ;;  %3672 = vmatprep.mubr.msk.f32.mxu1 %vm127_vm2, %v608_v37  ;;  %v3896_v38 = vpack.c.bf16 %v889_v32, %v888_v31 }
 0x381   :  { %v701_v44 = vpack.c.bf16 %v609_v40, %v608_v37  ;;  %3673 = vmatmul.mubr.msk.f32.vlgmr.msra.gmra.mrb[4].mxu1 %vm127_vm2, %v609_v40  ;;  %v1619_v37 = vld [vmem:[%s5692_s4 + $0xf8] sm:$0xff] }
 0x382   :  { %3879 = vmatpush3.bf16.msra.mxu1 %v3876_v30  ;;  %v3968_v40 = vpack.c.bf16 %v1619_v37, %v1611_v36 }
 0x383   :  { %3676 = vmatpush3.bf16.msra.mxu0 %v701_v44  ;;  %3881 = vmatprep.subr.bf16.mxu1 %v3880_v41  ;;  %v840_v44 = vld [vmem:[%s5693_s3] sm:$0xff] }
 0x384   :  { %3700 = vmatprep.subr.bf16.mxu0 %v4251_v0 }
 0x386   :  { %3678 = vmatmul.mubr.msk.bf16.vlgmr.msra.gmra.mrb[16].mxu0 %vm74_vm1, %v4361_v4  ;;  %3883 = vmatpush3.bf16.msra.mxu1 %v3880_v41  ;;  %v1610_v41 = vld [vmem:[%s5692_s4 + $0xb0] sm:$0xff] }
 0x387   :  { %3885 = vmatprep.subr.bf16.mxu1 %v3884_v45  ;;  %3702 = vmatprep.mubr.msk.bf16.mxu0 %vm4252_vm0, %v4251_v0  ;;  %v3970_v43 = vpack.c.bf16 %v1618_v42, %v1610_v41 }
 0x38a   :  { %3887 = vmatpush3.bf16.msra.mxu1 %v3884_v45  ;;  %v841_v45 = vld [vmem:[%s5693_s3 + $0x8] sm:$0xff] }
 0x38b   :  { %3889 = vmatprep.subr.bf16.mxu1 %v3888_v48  ;;  %v3900_v46 = vpack.c.bf16 %v841_v45, %v840_v44  ;;  %v1501_v44 = vld [vmem:[%s5693_s3 + $0xb8] sm:$0xff] }
 0x38e   :  { %3891 = vmatpush3.bf16.msra.mxu1 %v3888_v48  ;;  %v843_v48 = vld [vmem:[%s5693_s3 + $0x18] sm:$0xff] }
 0x38f   :  { %3941 = vmatprep.subr.bf16.mxu1 %v3940_v53  ;;  %v3904_v53 = vpack.c.bf16 %v843_v48, %v842_v47  ;;  %v1986_v48 = vld [vmem:[%s5692_s4 + $0x108] sm:$0xff] }
 0x459   :  { %v736_v54 = vpop.f32.mrb[16].mxu0 }
 0x45a   :  { %v743_v55 = vmul.f32 2.0, %v736_v54  ;;  %v3679_v56 = vpop.f32.mrb[17].mxu0 }
 0x45b   :  { %v739_v59 = vpop.f32.mrb[18].mxu0 }
 0x45c   :  { %v745_v60 = vsub.f32 %v743_v55, %v4517_v16  ;;  %v744_v61 = vmul.f32 2.0, %v739_v59  ;;  %v3680_v62 = vpop.f32.mrb[19].mxu0  ;;  %v3908_v59 = vpack.c.bf16 %v1100_v58, %v1099_v57 }
 0x45e   :  { %v746_v1 = vsub.f32 %v744_v61, %v4520_v19  ;;  %3697 = vmatprep.mubr.msk.f32.mxu1 %vm127_vm2, %v745_v60  ;;  %v1101_v60 = vld [vmem:[%s5693_s3 + $0x50] sm:$0xff]  ;;  %v1102_v61 = vld [vmem:[%s5693_s3 + $0x58] sm:$0xff] }
 0x45f   :  { %v3912_v62 = vpack.c.bf16 %v1102_v61, %v1101_v60  ;;  %v1600_v60 = vld [vmem:[%s5692_s4 + $0x60] sm:$0xff] }
 0x460   :  { %3698 = vmatmul.mubr.msk.f32.vlgmr.msra.gmra.mrb[4].mxu1 %vm127_vm2, %v746_v1 }
 0x461   :  { %3943 = vmatpush1.bf16.msra.mxu1 %v3942_v63  ;;  %1684 = vmatprep.mubr.f32.mxu1 %v4251_v0 }
 0x462   :  { %3945 = vmatprep.subr.bf16.mxu1 %v3944_v5 }
 0x465   :  { %3947 = vmatpush1.bf16.msra.mxu1 %v3946_v8  ;;  %v1232_v8 = vld [vmem:[%s5693_s3 + $0x60] sm:$0xff] }
 0x466   :  { %3949 = vmatprep.subr.bf16.mxu1 %v3948_v11  ;;  %v3916_v11 = vpack.c.bf16 %v1233_v9, %v1232_v8  ;;  %v1608_v8 = vld [vmem:[%s5692_s4 + $0xa0] sm:$0xff] }
 0x467   :  { %v1616_v9 = vld [vmem:[%s5692_s4 + $0xe0] sm:$0xff] }
 0x533   :  { %v3699_v12 = vpop.f32.mrb[4].mxu1 }
 0x534   :  { %v4196_v15 = vadd.f32 %v3699_v12, %v4465_v49  ;;  %v827_v16 = vpop.f32.mrb[5].mxu1 }
 0x535   :  { %v4197_v19 = vadd.f32 %v827_v16, %v4467_v50  ;;  %v1614_v50 = vld [vmem:[%s5692_s4 + $0xd0] sm:$0xff] }
 0x536   :  { %v4633_v49 = vmax.f32 %v4196_v15, 0.0  ;;  %v3954_v30 = vpack.c.bf16 %v1614_v50, %v1606_v25  ;;  %v3920_v15 = vpack.c.bf16 %v1235_v14, %v1234_v13  ;;  %v1366_v25 = vld [vmem:[%s5693_s3 + $0x88] sm:$0xff]  ;;  %v1989_v14 = vld [vmem:[%s5692_s4 + $0x120] sm:$0xff] }
 0x537   :  { %v4635_v23 = vmax.f32 %v4197_v19, 0.0 }
 0x539   :  { %3232 = vmatmul.mubr.msk.f32.vlgmr.msra.gmra.mrb[6].mxu1 %vm890_vm3, %v4635_v23  ;;  %v844_v29 = vpack.c.bf16 %v4633_v49, %v4635_v23 }
 0x53a   :  { %3951 = vmatpush1.bf16.msra.mxu1 %v3950_v22  ;;  %1690 = vmatprep.mubr.f32.mxu1 %v4251_v0 }
 0x53b   :  { %3701 = vmatpush3.bf16.msra.mxu0 %v844_v29  ;;  %3953 = vmatprep.subr.bf16.mxu1 %v3952_v24  ;;  %v1365_v24 = vld [vmem:[%s5693_s3 + $0x80] sm:$0xff]  ;;  %v1368_v29 = vld [vmem:[%s5693_s3 + $0x98] sm:$0xff] }
 0x53c   :  { %3893 = vmatprep.subr.bf16.mxu0 %v3892_v28  ;;  %v3924_v26 = vpack.c.bf16 %v1366_v25, %v1365_v24  ;;  %v2005_v25 = vld [vmem:[%s5692_s4 + $0x1a0] sm:$0xff] }
 0x53d   :  { %3233 = vmatmul.mubr.msk.f32.gmra.mrb[8].mxu1 %vm890_vm3, %v4633_v49 }
 0x53e   :  { %3703 = vmatmul.mubr.msk.bf16.vlgmr.msra.gmra.mrb[20].mxu0 %vm74_vm1, %v4361_v4  ;;  %3955 = vmatpush1.bf16.msra.mxu1 %v3954_v30 }
 0x53f   :  { %1761 = vmatprep.mubr.f32.mxu1 %v4251_v0  ;;  %3965 = vmatprep.subr.bf16.mxu1 %v3964_v33 }
 0x540   :  { %3895 = vmatpush3.bf16.msra.mxu0 %v3892_v28  ;;  %v1367_v28 = vld [vmem:[%s5693_s3 + $0x90] sm:$0xff] }
 0x541   :  { %3234 = vmatmul.mubr.msk.f32.vlgmr.msra.gmra.mrb[10].mxu1 %vm890_vm3, %v4635_v23  ;;  %3897 = vmatprep.subr.bf16.mxu0 %v3896_v38  ;;  %v3928_v30 = vpack.c.bf16 %v1368_v29, %v1367_v28  ;;  %v1996_v28 = vld [vmem:[%s5692_s4 + $0x158] sm:$0xff] }
 0x542   :  { %3967 = vmatpush1.bf16.msra.mxu1 %v3966_v39  ;;  %1767 = vmatprep.mubr.f32.mxu1 %v4251_v0  ;;  %v1499_v39 = vld [vmem:[%s5693_s3 + $0xa8] sm:$0xff] }
 0x543   :  { %3969 = vmatprep.subr.bf16.mxu1 %v3968_v40 }
 0x544   :  { %3899 = vmatpush3.bf16.msra.mxu0 %v3896_v38  ;;  %v1498_v38 = vld [vmem:[%s5693_s3 + $0xa0] sm:$0xff] }
 0x545   :  { %3235 = vmatmul.mubr.msk.f32.gmra.mrb[12].mxu1 %vm890_vm3, %v4633_v49  ;;  %3901 = vmatprep.subr.bf16.mxu0 %v3900_v46  ;;  %v3932_v41 = vpack.c.bf16 %v1499_v39, %v1498_v38  ;;  %v2479_v38 = vld [vmem:[%s5694_s8] sm:$0xff]  ;;  %v2480_v39 = vld [vmem:[%s5694_s8 + $0x8] sm:$0xff] }
 0x546   :  { %3971 = vmatpush1.bf16.msra.mxu1 %v3970_v43  ;;  %1915 = vmatprep.mubr.f32.mxu1 %v4251_v0  ;;  %v1500_v43 = vld [vmem:[%s5693_s3 + $0xb0] sm:$0xff] }
 0x547   :  { %v3936_v45 = vpack.c.bf16 %v1501_v44, %v1500_v43  ;;  %v2003_v44 = vld [vmem:[%s5692_s4 + $0x190] sm:$0xff] }
 0x549   :  { %3238 = vmatmul.mubr.msk.f32.vlgmr.msra.gmra.mrb[14].mxu1 %vm890_vm3, %v4635_v23 }
 0x54a   :  { %1921 = vmatprep.mubr.f32.mxu1 %v4251_v0 }
 0x54d   :  { %3239 = vmatmul.mubr.msk.f32.gmra.mrb[16].mxu1 %vm890_vm3, %v4633_v49 }
 0x54e   :  { %2087 = vmatprep.mubr.f32.mxu1 %v4251_v0 }
 0x611   :  { %v879_v51 = vpop.f32.mrb[20].mxu0 }
 0x612   :  { %v3704_v52 = vpop.f32.mrb[21].mxu0  ;;  %3714 = vmatprep.mubr.msk.f32.mxu0 %vm890_vm3, %v879_v51 }
 0x613   :  { %v882_v54 = vpop.f32.mrb[22].mxu0 }
 0x614   :  { %v1053_v55 = vpack.c.bf16 %v882_v54, %v879_v51  ;;  %3715 = vmatmul.mubr.msk.f32.vlgmr.msra.gmra.mrb[2].mxu0 %vm890_vm3, %v882_v54  ;;  %v3705_v56 = vpop.f32.mrb[23].mxu0 }
 0x615   :  { %3903 = vmatpush3.bf16.msra.mxu0 %v3900_v46  ;;  %3725 = vmatprep.mubr.msk.f32.mxu0 %vm890_vm3, %v4635_v23  ;;  %v1593_v46 = vld [vmem:[%s5692_s4 + $0x28] sm:$0xff] }
 0x616   :  { %3905 = vmatprep.subr.bf16.mxu0 %v3904_v53 }
 0x619   :  { %3907 = vmatpush3.bf16.msra.mxu0 %v3904_v53  ;;  %v1985_v53 = vld [vmem:[%s5692_s4 + $0x100] sm:$0xff] }
 0x61a   :  { %3728 = vmatprep.subr.bf16.mxu0 %v4251_v0 }
 0x61c   :  { %3726 = vmatmul.mubr.msk.f32.vlgmr.msra.gmra.mrb[2].mxu0 %vm890_vm3, %v4633_v49 }
 0x61d   :  { %3729 = vmatpush3.bf16.msra.mxu0 %v1053_v55  ;;  %3730 = vmatprep.mubr.msk.bf16.mxu0 %vm4252_vm0, %v4251_v0 }
 0x61e   :  { %3909 = vmatprep.subr.bf16.mxu0 %v3908_v59 }
 0x620   :  { %3731 = vmatmul.mubr.msk.bf16.vlgmr.msra.gmra.mrb[24].mxu0 %vm74_vm1, %v4361_v4 }
 0x621   :  { %3911 = vmatpush3.bf16.msra.mxu0 %v3908_v59  ;;  %v1592_v59 = vld [vmem:[%s5692_s4 + $0x20] sm:$0xff] }
 0x622   :  { %3913 = vmatprep.subr.bf16.mxu0 %v3912_v62 }
 0x625   :  { %3915 = vmatpush3.bf16.msra.mxu0 %v3912_v62  ;;  %v1609_v62 = vld [vmem:[%s5692_s4 + $0xa8] sm:$0xff] }
 0x626   :  { %3745 = vmatprep.subr.bf16.mxu0 %v4251_v0 }
 0x6f3   :  { %v1088_v63 = vpop.f32.mrb[24].mxu0 }
 0x6f4   :  { %v1095_v1 = vmul.f32 2.0, %v1088_v63  ;;  %v3732_v2 = vpop.f32.mrb[25].mxu0  ;;  %v1617_v63 = vld [vmem:[%s5692_s4 + $0xe8] sm:$0xff] }
 0x6f5   :  { %v1091_v3 = vpop.f32.mrb[26].mxu0 }
 0x6f6   :  { %v1097_v5 = vsub.f32 %v1095_v1, %v4635_v23  ;;  %v1096_v6 = vmul.f32 2.0, %v1091_v3  ;;  %v3733_v7 = vpop.f32.mrb[27].mxu0 }
 0x6f7   :  { %v3960_v7 = vpack.c.bf16 %v1617_v63, %v1609_v62  ;;  %v2008_v62 = vld [vmem:[%s5692_s4 + $0x1b8] sm:$0xff] }
 0x6f8   :  { %v1098_v10 = vsub.f32 %v1096_v6, %v4633_v49  ;;  %3742 = vmatprep.mubr.msk.f32.mxu0 %vm890_vm3, %v1097_v5  ;;  %v2016_v63 = vld [vmem:[%s5692_s4 + $0x1f8] sm:$0xff] }
 0x6fa   :  { %v1186_v12 = vpack.c.bf16 %v1098_v10, %v1097_v5  ;;  %3743 = vmatmul.mubr.msk.f32.vlgmr.msra.gmra.mrb[2].mxu0 %vm890_vm3, %v1098_v10 }
 0x6fb   :  { %3747 = vmatprep.mubr.msk.bf16.mxu0 %vm4252_vm0, %v4251_v0 }
 0x6fc   :  { %3746 = vmatpush3.bf16.msra.mxu0 %v1186_v12  ;;  %v3962_v12 = vpack.c.bf16 %v1616_v9, %v1608_v8  ;;  %v2502_v8 = vld [vmem:[%s5694_s8 + $0xb8] sm:$0xff]  ;;  %v4000_v9 = vpack.c.bf16 %v2016_v63, %v2008_v62  ;;  %v2519_v62 = vld [vmem:[%s5694_s8 + $0x140] sm:$0xff]  ;;  %v2520_v63 = vld [vmem:[%s5694_s8 + $0x148] sm:$0xff] }
 0x6fd   :  { %3917 = vmatprep.subr.bf16.mxu0 %v3916_v11 }
 0x6ff   :  { %3748 = vmatmul.mubr.msk.bf16.vlgmr.msra.gmra.mrb[28].mxu0 %vm74_vm1, %v4361_v4 }
 0x700   :  { %3919 = vmatpush3.bf16.msra.mxu0 %v3916_v11  ;;  %v1998_v11 = vld [vmem:[%s5692_s4 + $0x168] sm:$0xff] }
 0x701   :  { %3921 = vmatprep.subr.bf16.mxu0 %v3920_v15 }
 0x704   :  { %3923 = vmatpush3.bf16.msra.mxu0 %v3920_v15  ;;  %v1997_v15 = vld [vmem:[%s5692_s4 + $0x160] sm:$0xff] }
 0x705   :  { %3762 = vmatprep.subr.bf16.mxu0 %v4251_v0 }
 0x7d2   :  { %v1221_v16 = vpop.f32.mrb[28].mxu0 }
 0x7d3   :  { %v1228_v17 = vmul.f32 2.0, %v1221_v16  ;;  %v3749_v18 = vpop.f32.mrb[29].mxu0  ;;  %v3990_v16 = vpack.c.bf16 %v1997_v15, %v1989_v14 }
 0x7d4   :  { %v1224_v19 = vpop.f32.mrb[30].mxu0  ;;  %v2010_v18 = vld [vmem:[%s5692_s4 + $0x1c8] sm:$0xff] }
 0x7d5   :  { %v4752_v20 = vsub.f32 %v1228_v17, %v879_v51  ;;  %v1229_v21 = vmul.f32 2.0, %v1224_v19  ;;  %v3750_v22 = vpop.f32.mrb[31].mxu0  ;;  %v1994_v51 = vld [vmem:[%s5692_s4 + $0x148] sm:$0xff] }
 0x7d6   :  { %v3972_v52 = vpack.c.bf16 %v1994_v51, %v1986_v48  ;;  %v2002_v17 = vld [vmem:[%s5692_s4 + $0x188] sm:$0xff]  ;;  %v2497_v48 = vld [vmem:[%s5694_s8 + $0x90] sm:$0xff]  ;;  %v2498_v51 = vld [vmem:[%s5694_s8 + $0x98] sm:$0xff] }
 0x7d7   :  { %v4760_v50 = vsub.f32 %v1229_v21, %v882_v54  ;;  %3759 = vmatprep.mubr.msk.f32.mxu0 %vm890_vm3, %v4752_v20  ;;  %v1993_v54 = vld [vmem:[%s5692_s4 + $0x140] sm:$0xff]  ;;  %v3976_v19 = vpack.c.bf16 %v2010_v18, %v2002_v17  ;;  %v2486_v17 = vld [vmem:[%s5694_s8 + $0x38] sm:$0xff] }
 0x7d8   :  { %v3974_v55 = vpack.c.bf16 %v1993_v54, %v1985_v53  ;;  %3973 = vmatprep.subr.bf16.mxu1 %v3972_v52  ;;  %v2009_v21 = vld [vmem:[%s5692_s4 + $0x1c0] sm:$0xff]  ;;  %v2481_v52 = vld [vmem:[%s5694_s8 + $0x10] sm:$0xff]  ;;  %v2482_v53 = vld [vmem:[%s5694_s8 + $0x18] sm:$0xff] }
 0x7d9   :  { %v1319_v27 = vpack.c.bf16 %v4760_v50, %v4752_v20  ;;  %3760 = vmatmul.mubr.msk.f32.vlgmr.msra.gmra.mrb[2].mxu0 %vm890_vm3, %v4760_v50 }
 0x7da   :  { %3764 = vmatprep.mubr.msk.bf16.mxu0 %vm4252_vm0, %v4251_v0  ;;  %3975 = vmatpush1.bf16.msra.mxu1 %v3974_v55  ;;  %v2499_v55 = vld [vmem:[%s5694_s8 + $0xa0] sm:$0xff] }
 0x7db   :  { %3763 = vmatpush3.bf16.msra.mxu0 %v1319_v27  ;;  %3977 = vmatprep.subr.bf16.mxu1 %v3976_v19  ;;  %v1988_v27 = vld [vmem:[%s5692_s4 + $0x118] sm:$0xff]  ;;  %v2504_v19 = vld [vmem:[%s5694_s8 + $0xc8] sm:$0xff] }
 0x7dc   :  { %3925 = vmatprep.subr.bf16.mxu0 %v3924_v26  ;;  %v3980_v29 = vpack.c.bf16 %v1996_v28, %v1988_v27  ;;  %v2488_v27 = vld [vmem:[%s5694_s8 + $0x48] sm:$0xff] }
 0x7de   :  { %3765 = vmatmul.mubr.msk.bf16.vlgmr.msra.gmra.mrb[32].mxu0 %vm74_vm1, %v4361_v4 }
 0x7df   :  { %3927 = vmatpush3.bf16.msra.mxu0 %v3924_v26 }
 0x7e0   :  { %3929 = vmatprep.subr.bf16.mxu0 %v3928_v30 }
 0x7e3   :  { %3931 = vmatpush3.bf16.msra.mxu0 %v3928_v30  ;;  %v2495_v30 = vld [vmem:[%s5694_s8 + $0x80] sm:$0xff] }
 0x7e4   :  { %3779 = vmatprep.subr.bf16.mxu0 %v4251_v0 }
 0x8b1   :  { %v1354_v31 = vpop.f32.mrb[32].mxu0 }
 0x8b2   :  { %v1361_v32 = vmul.f32 2.0, %v1354_v31  ;;  %v3766_v33 = vpop.f32.mrb[33].mxu0  ;;  %v2496_v31 = vld [vmem:[%s5694_s8 + $0x88] sm:$0xff] }
 0x8b3   :  { %v1357_v34 = vpop.f32.mrb[34].mxu0  ;;  %v1987_v33 = vld [vmem:[%s5692_s4 + $0x110] sm:$0xff] }
 0x8b4   :  { %v1363_v35 = vsub.f32 %v1361_v32, %v1097_v5  ;;  %v1362_v36 = vmul.f32 2.0, %v1357_v34  ;;  %v3767_v37 = vpop.f32.mrb[35].mxu0  ;;  %v3958_v5 = vpack.c.bf16 %v1600_v60, %v1592_v59  ;;  %v4004_v32 = vpack.c.bf16 %v2496_v31, %v2495_v30  ;;  %v1995_v34 = vld [vmem:[%s5692_s4 + $0x150] sm:$0xff]  ;;  %v2506_v30 = vld [vmem:[%s5694_s8 + $0xd8] sm:$0xff] }
 0x8b5   :  { %v1991_v59 = vld [vmem:[%s5692_s4 + $0x130] sm:$0xff] }
 0x8b6   :  { %v1364_v40 = vsub.f32 %v1362_v36, %v1098_v10  ;;  %3776 = vmatprep.mubr.msk.f32.mxu0 %vm890_vm3, %v1363_v35  ;;  %v1990_v10 = vld [vmem:[%s5692_s4 + $0x128] sm:$0xff]  ;;  %v2012_v36 = vld [vmem:[%s5692_s4 + $0x1d8] sm:$0xff]  ;;  %v1999_v60 = vld [vmem:[%s5692_s4 + $0x170] sm:$0xff] }
 0x8b7   :  { %v3988_v13 = vpack.c.bf16 %v1998_v11, %v1990_v10  ;;  %v2007_v10 = vld [vmem:[%s5692_s4 + $0x1b0] sm:$0xff] }
 0x8b8   :  { %v1452_v42 = vpack.c.bf16 %v1364_v40, %v1363_v35  ;;  %3777 = vmatmul.mubr.msk.f32.vlgmr.msra.gmra.mrb[2].mxu0 %vm890_vm3, %v1364_v40  ;;  %v2004_v35 = vld [vmem:[%s5692_s4 + $0x198] sm:$0xff]  ;;  %v2015_v11 = vld [vmem:[%s5692_s4 + $0x1f0] sm:$0xff] }
 0x8b9   :  { %3781 = vmatprep.mubr.msk.bf16.mxu0 %vm4252_vm0, %v4251_v0  ;;  %v3984_v43 = vpack.c.bf16 %v2012_v36, %v2004_v35  ;;  %v4002_v18 = vpack.c.bf16 %v2015_v11, %v2007_v10  ;;  %v2532_v35 = vld [vmem:[%s5694_s8 + $0x1a8] sm:$0xff]  ;;  %v2494_v10 = vld [vmem:[%s5694_s8 + $0x78] sm:$0xff]  ;;  %v2521_v11 = vld [vmem:[%s5694_s8 + $0x150] sm:$0xff] }
 0x8ba   :  { %3780 = vmatpush3.bf16.msra.mxu0 %v1452_v42 }
 0x8bb   :  { %3933 = vmatprep.subr.bf16.mxu0 %v3932_v41 }
 0x8bd   :  { %3782 = vmatmul.mubr.msk.bf16.vlgmr.msra.gmra.mrb[36].mxu0 %vm74_vm1, %v4361_v4  ;;  %v1601_v4 = vld [vmem:[%s5692_s4 + $0x68] sm:$0xff] }
 0x8be   :  { %3935 = vmatpush3.bf16.msra.mxu0 %v3932_v41  ;;  %v3956_v47 = vpack.c.bf16 %v1601_v4, %v1593_v46  ;;  %v3982_v41 = vpack.c.bf16 %v1995_v34, %v1987_v33  ;;  %v1992_v46 = vld [vmem:[%s5692_s4 + $0x138] sm:$0xff]  ;;  %v2531_v34 = vld [vmem:[%s5694_s8 + $0x1a0] sm:$0xff] }
 0x8bf   :  { %3937 = vmatprep.subr.bf16.mxu0 %v3936_v45  ;;  %v2000_v4 = vld [vmem:[%s5692_s4 + $0x178] sm:$0xff] }
 0x8c0   :  { %v2514_v33 = vld [vmem:[%s5694_s8 + $0x118] sm:$0xff] }
 0x8c2   :  { %3939 = vmatpush3.bf16.msra.mxu0 %v3936_v45  ;;  %v2011_v45 = vld [vmem:[%s5692_s4 + $0x1d0] sm:$0xff] }
 0x8c3   :  { %3957 = vmatprep.subr.bf16.mxu0 %v3956_v47  ;;  %v4006_v47 = vpack.c.bf16 %v2480_v39, %v2479_v38  ;;  %v3986_v54 = vpack.c.bf16 %v2011_v45, %v2003_v44  ;;  %v2489_v38 = vld [vmem:[%s5694_s8 + $0x50] sm:$0xff]  ;;  %v2490_v39 = vld [vmem:[%s5694_s8 + $0x58] sm:$0xff] }
 0x8c4   :  { %v2533_v44 = vld [vmem:[%s5694_s8 + $0x1b0] sm:$0xff]  ;;  %v2534_v45 = vld [vmem:[%s5694_s8 + $0x1b8] sm:$0xff] }
 0x990   :  { %v1487_v56 = vpop.f32.mrb[36].mxu0 }
 0x991   :  { %v1494_v57 = vmul.f32 2.0, %v1487_v56  ;;  %v3783_v58 = vpop.f32.mrb[37].mxu0  ;;  %v2500_v56 = vld [vmem:[%s5694_s8 + $0xa8] sm:$0xff] }
 0x992   :  { %v1490_v61 = vpop.f32.mrb[38].mxu0  ;;  %v3996_v58 = vpack.c.bf16 %v2000_v4, %v1992_v46  ;;  %v4026_v46 = vpack.c.bf16 %v2490_v39, %v2489_v38  ;;  %v5177_v38 = vld [vmem:[%s5696_s6] sm:$0xff] }
 0x993   :  { %v1496_v1 = vsub.f32 %v1494_v57, %v4752_v20  ;;  %v1495_v2 = vmul.f32 2.0, %v1490_v61  ;;  %v3784_v3 = vpop.f32.mrb[39].mxu0  ;;  %v2014_v20 = vld [vmem:[%s5692_s4 + $0x1e8] sm:$0xff]  ;;  %v4008_v61 = vpack.c.bf16 %v2498_v51, %v2497_v48  ;;  %v2517_v48 = vld [vmem:[%s5694_s8 + $0x130] sm:$0xff]  ;;  %v2518_v51 = vld [vmem:[%s5694_s8 + $0x138] sm:$0xff] }
 0x994   :  { %v2483_v3 = vld [vmem:[%s5694_s8 + $0x20] sm:$0xff] }
 0x995   :  { %v1497_v6 = vsub.f32 %v1495_v2, %v4760_v50  ;;  %3793 = vmatprep.mubr.msk.f32.mxu0 %vm890_vm3, %v1496_v1  ;;  %v2013_v50 = vld [vmem:[%s5692_s4 + $0x1e0] sm:$0xff]  ;;  %v4010_v1 = vpack.c.bf16 %v2482_v53, %v2481_v52  ;;  %v4012_v2 = vpack.c.bf16 %v2500_v56, %v2499_v55  ;;  %v4050_v52 = vpack.c.bf16 %v2518_v51, %v2517_v48 }
 0x996   :  { %v3994_v26 = vpack.c.bf16 %v2013_v50, %v2005_v25  ;;  %v2507_v53 = vld [vmem:[%s5694_s8 + $0xe0] sm:$0xff] }
 0x997   :  { %3794 = vmatmul.mubr.msk.f32.vlgmr.msra.gmra.mrb[2].mxu0 %vm890_vm3, %v1497_v6  ;;  %v3998_v6 = vpack.c.bf16 %v1999_v60, %v1991_v59  ;;  %v2535_v55 = vld [vmem:[%s5694_s8 + $0x1c0] sm:$0xff]  ;;  %v2492_v59 = vld [vmem:[%s5694_s8 + $0x68] sm:$0xff] }
 0x998   :  { %3959 = vmatpush1.bf16.msra.mxu0 %v3958_v5  ;;  %1838 = vmatprep.mubr.f32.mxu0 %v4251_v0  ;;  %v2484_v5 = vld [vmem:[%s5694_s8 + $0x28] sm:$0xff] }
 0x999   :  { %3961 = vmatprep.subr.bf16.mxu0 %v3960_v7  ;;  %v2501_v7 = vld [vmem:[%s5694_s8 + $0xb0] sm:$0xff]  ;;  %v4014_v14 = vpack.c.bf16 %v2484_v5, %v2483_v3  ;;  %v2510_v3 = vld [vmem:[%s5694_s8 + $0xf8] sm:$0xff] }
 0x99a   :  { %v4016_v15 = vpack.c.bf16 %v2502_v8, %v2501_v7  ;;  %v2537_v5 = vld [vmem:[%s5694_s8 + $0x1d0] sm:$0xff]  ;;  %v2538_v7 = vld [vmem:[%s5694_s8 + $0x1d8] sm:$0xff] }
 0x99b   :  { %v2493_v8 = vld [vmem:[%s5694_s8 + $0x70] sm:$0xff] }
 0x99c   :  { %3963 = vmatpush1.bf16.msra.mxu0 %v3962_v12  ;;  %v2527_v12 = vld [vmem:[%s5694_s8 + $0x180] sm:$0xff] }
 0x99d   :  { %3989 = vmatprep.subr.bf16.mxu0 %v3988_v13  ;;  %v2528_v13 = vld [vmem:[%s5694_s8 + $0x188] sm:$0xff] }
 0x99f   :  { %3236 = vmatmul.mubr.msk.f32.vlgmr.msra.gmra.mrb[40].mxu0 %vm890_vm3, %v4635_v23  ;;  %v2006_v23 = vld [vmem:[%s5692_s4 + $0x1a8] sm:$0xff] }
 0x9a0   :  { %1844 = vmatprep.mubr.f32.mxu0 %v4251_v0  ;;  %3991 = vmatpush1.bf16.msra.mxu0 %v3990_v16  ;;  %v3992_v22 = vpack.c.bf16 %v2014_v20, %v2006_v23  ;;  %v2485_v16 = vld [vmem:[%s5694_s8 + $0x30] sm:$0xff]  ;;  %v2503_v23 = vld [vmem:[%s5694_s8 + $0xc0] sm:$0xff]  ;;  %v4036_v20 = vpack.c.bf16 %v2528_v13, %v2527_v12  ;;  %v2522_v12 = vld [vmem:[%s5694_s8 + $0x158] sm:$0xff]  ;;  %v4034_v13 = vpack.c.bf16 %v2494_v10, %v2493_v8 }
 0x9a1   :  { %v4018_v25 = vpack.c.bf16 %v2486_v17, %v2485_v16  ;;  %v4020_v50 = vpack.c.bf16 %v2504_v19, %v2503_v23  ;;  %v2540_v16 = vld [vmem:[%s5694_s8 + $0x1e8] sm:$0xff]  ;;  %v2559_v17 = vld [vmem:[%s5694_s8 + $0x280] sm:$0xff]  ;;  %v2561_v10 = vld [vmem:[%s5694_s8 + $0x290] sm:$0xff] }
 0x9a2   :  { %3993 = vmatprep.subr.bf16.mxu0 %v3992_v22  ;;  %v2529_v22 = vld [vmem:[%s5694_s8 + $0x190] sm:$0xff]  ;;  %v2560_v23 = vld [vmem:[%s5694_s8 + $0x288] sm:$0xff]  ;;  %v2523_v19 = vld [vmem:[%s5694_s8 + $0x160] sm:$0xff] }
 0x9a3   :  { %3237 = vmatmul.mubr.msk.f32.gmra.mrb[42].mxu0 %vm890_vm3, %v4633_v49  ;;  %v2001_v49 = vld [vmem:[%s5692_s4 + $0x180] sm:$0xff] }
 0x9a4   :  { %2241 = vmatprep.mubr.f32.mxu0 %v4251_v0  ;;  %v3978_v24 = vpack.c.bf16 %v2009_v21, %v2001_v49  ;;  %3995 = vmatpush1.bf16.msra.mxu0 %v3994_v26  ;;  %v2511_v49 = vld [vmem:[%s5694_s8 + $0x100] sm:$0xff]  ;;  %v2512_v21 = vld [vmem:[%s5694_s8 + $0x108] sm:$0xff] }
 0x9a5   :  { %4005 = vmatprep.subr.bf16.mxu0 %v4004_v32  ;;  %v2487_v26 = vld [vmem:[%s5694_s8 + $0x40] sm:$0xff]  ;;  %v4038_v28 = vpack.c.bf16 %v2512_v21, %v2511_v49  ;;  %v2513_v32 = vld [vmem:[%s5694_s8 + $0x110] sm:$0xff]  ;;  %v4068_v49 = vpack.c.bf16 %v2560_v23, %v2559_v17 }
 0x9a6   :  { %3979 = vmatpush1.bf16.msra.mxu1 %v3978_v24  ;;  %v2530_v24 = vld [vmem:[%s5694_s8 + $0x198] sm:$0xff]  ;;  %v4022_v36 = vpack.c.bf16 %v2488_v27, %v2487_v26 }
 0x9a7   :  { %3981 = vmatprep.subr.bf16.mxu1 %v3980_v29  ;;  %v2505_v29 = vld [vmem:[%s5694_s8 + $0xd0] sm:$0xff]  ;;  %v4040_v31 = vpack.c.bf16 %v2530_v24, %v2529_v22  ;;  %v2542_v24 = vld [vmem:[%s5694_s8 + $0x1f8] sm:$0xff] }
 0x9a8   :  { %v2541_v22 = vld [vmem:[%s5694_s8 + $0x1f0] sm:$0xff]  ;;  %v2526_v26 = vld [vmem:[%s5694_s8 + $0x178] sm:$0xff] }
 0xa6a   :  { %v3795_v37 = vpop.f32.mrb[2].mxu0 }
 0xa6b   :  { %v1574_v40 = vpop.f32.mrb[3].mxu0  ;;  %v4947_v57 = vmax.f32 %v3795_v37, 0.0  ;;  %v4024_v37 = vpack.c.bf16 %v2506_v30, %v2505_v29  ;;  %v2592_v29 = vld [vmem:[%s5694_s8 + $0x388] sm:$0xff] }
 0xa6c   :  { %v4910_v42 = vmax.f32 %v1574_v40, 0.0  ;;  %v4042_v40 = vpack.c.bf16 %v2514_v33, %v2513_v32 }
 0xa6e   :  { %3240 = vmatmul.mubr.msk.f32.vlgmr.msra.gmra.mrb[6].mxu1 %vm890_vm3, %v4910_v42  ;;  %3244 = vmatmul.mubr.msk.f32.vlgmr.msra.gmra.mrb[40].mxu0 %vm890_vm3, %v4910_v42 }
 0xa6f   :  { %3983 = vmatpush1.bf16.msra.mxu1 %v3982_v41  ;;  %2093 = vmatprep.mubr.f32.mxu1 %v4251_v0  ;;  %v4044_v41 = vpack.c.bf16 %v2532_v35, %v2531_v34  ;;  %v5166_v34 = vld [vmem:[%s5695_s5] sm:$0xff] }
 0xa70   :  { %2247 = vmatprep.mubr.f32.mxu0 %v4251_v0  ;;  %3985 = vmatprep.subr.bf16.mxu1 %v3984_v43  ;;  %v2516_v43 = vld [vmem:[%s5694_s8 + $0x128] sm:$0xff] }
 0xa71   :  { %4007 = vmatpush3.bf16.msra.mxu0 %v4006_v47  ;;  %v4048_v47 = vpack.c.bf16 %v2534_v45, %v2533_v44  ;;  %v5191_v45 = vld [vmem:[%s5697_s7] sm:$0xff] }
 0xa72   :  { %3241 = vmatmul.mubr.msk.f32.gmra.mrb[8].mxu1 %vm890_vm3, %v4947_v57  ;;  %3245 = vmatmul.mubr.msk.f32.gmra.mrb[42].mxu0 %vm890_vm3, %v4947_v57 }
 0xa73   :  { %3987 = vmatpush1.bf16.msra.mxu1 %v3986_v54  ;;  %2164 = vmatprep.mubr.f32.mxu1 %v4251_v0  ;;  %v2508_v54 = vld [vmem:[%s5694_s8 + $0xe8] sm:$0xff] }
 0xa74   :  { %3997 = vmatprep.subr.bf16.mxu1 %v3996_v58  ;;  %4009 = vmatprep.subr.bf16.mxu0 %v4008_v61  ;;  %v4028_v56 = vpack.c.bf16 %v2508_v54, %v2507_v53  ;;  %v2491_v58 = vld [vmem:[%s5694_s8 + $0x60] sm:$0xff] }
 0xa75   :  { %4011 = vmatpush3.bf16.msra.mxu0 %v4010_v1  ;;  %v4030_v61 = vpack.c.bf16 %v2492_v59, %v2491_v58  ;;  %v4054_v1 = vpack.c.bf16 %v2520_v63, %v2519_v62 }
 0xa76   :  { %3242 = vmatmul.mubr.msk.f32.vlgmr.msra.gmra.mrb[10].mxu1 %vm890_vm3, %v4910_v42  ;;  %4013 = vmatprep.subr.bf16.mxu0 %v4012_v2  ;;  %v2509_v2 = vld [vmem:[%s5694_s8 + $0xf0] sm:$0xff] }
 0xa77   :  { %3999 = vmatpush1.bf16.msra.mxu1 %v3998_v6  ;;  %2170 = vmatprep.mubr.f32.mxu1 %v4251_v0  ;;  %v4032_v6 = vpack.c.bf16 %v2510_v3, %v2509_v2  ;;  %v2543_v3 = vld [vmem:[%s5694_s8 + $0x200] sm:$0xff] }
 0xa78   :  { %4001 = vmatprep.subr.bf16.mxu1 %v4000_v9  ;;  %v4056_v9 = vpack.c.bf16 %v2538_v7, %v2537_v5  ;;  %v2544_v5 = vld [vmem:[%s5694_s8 + $0x208] sm:$0xff] }
 0xa79   :  { %4015 = vmatpush3.bf16.msra.mxu0 %v4014_v14  ;;  %v4058_v14 = vpack.c.bf16 %v2522_v12, %v2521_v11  ;;  %v2562_v11 = vld [vmem:[%s5694_s8 + $0x298] sm:$0xff]  ;;  %v4070_v23 = vpack.c.bf16 %v2544_v5, %v2543_v3 }
 0xa7a   :  { %3243 = vmatmul.mubr.msk.f32.gmra.mrb[12].mxu1 %vm890_vm3, %v4947_v57  ;;  %4017 = vmatprep.subr.bf16.mxu0 %v4016_v15  ;;  %v2539_v15 = vld [vmem:[%s5694_s8 + $0x1e0] sm:$0xff]  ;;  %v2594_v3 = vld [vmem:[%s5694_s8 + $0x398] sm:$0xff] }
 0xa7b   :  { %4003 = vmatpush1.bf16.msra.mxu1 %v4002_v18  ;;  %2318 = vmatprep.mubr.f32.mxu1 %v4251_v0  ;;  %v4060_v18 = vpack.c.bf16 %v2540_v16, %v2539_v15 }
 0xa7c   :  { %4037 = vmatprep.subr.bf16.mxu1 %v4036_v20  ;;  %v2524_v20 = vld [vmem:[%s5694_s8 + $0x168] sm:$0xff] }
 0xa7d   :  { %4019 = vmatpush3.bf16.msra.mxu0 %v4018_v25  ;;  %v4062_v21 = vpack.c.bf16 %v2524_v20, %v2523_v19  ;;  %v4064_v25 = vpack.c.bf16 %v2542_v24, %v2541_v22  ;;  %v4072_v22 = vpack.c.bf16 %v2562_v11, %v2561_v10  ;;  %v2545_v24 = vld [vmem:[%s5694_s8 + $0x210] sm:$0xff] }
 0xa7e   :  { %3246 = vmatmul.mubr.msk.f32.vlgmr.msra.gmra.mrb[14].mxu1 %vm890_vm3, %v4910_v42  ;;  %4021 = vmatprep.subr.bf16.mxu0 %v4020_v50  ;;  %v2515_v42 = vld [vmem:[%s5694_s8 + $0x120] sm:$0xff]  ;;  %v2525_v50 = vld [vmem:[%s5694_s8 + $0x170] sm:$0xff] }
 0xa7f   :  { %2324 = vmatprep.mubr.f32.mxu1 %v4251_v0  ;;  %4039 = vmatpush3.bf16.msra.mxu1 %v4038_v28  ;;  %v4046_v4 = vpack.c.bf16 %v2516_v43, %v2515_v42  ;;  %v4066_v27 = vpack.c.bf16 %v2526_v26, %v2525_v50  ;;  %v2591_v28 = vld [vmem:[%s5694_s8 + $0x380] sm:$0xff]  ;;  %v2549_v11 = vld [vmem:[%s5694_s8 + $0x230] sm:$0xff] }
 0xa80   :  { %4041 = vmatprep.subr.bf16.mxu1 %v4040_v31  ;;  %v4100_v30 = vpack.c.bf16 %v2592_v29, %v2591_v28  ;;  %v1929_v31 = vlaneseq  ;;  %v2563_v29 = vld [vmem:[%s5694_s8 + $0x2a0] sm:$0xff] }
 0xa81   :  { %4023 = vmatpush3.bf16.msra.mxu0 %v4022_v36 }
 0xa82   :  { %3247 = vmatmul.mubr.msk.f32.gmra.mrb[16].mxu1 %vm890_vm3, %v4947_v57  ;;  %4025 = vmatprep.subr.bf16.mxu0 %v4024_v37  ;;  %v2536_v57 = vld [vmem:[%s5694_s8 + $0x1c8] sm:$0xff]  ;;  %v5158_v32 = vshrl.u32 %v1929_v31, 7 }
 0xa83   :  { %4043 = vmatpush3.bf16.msra.mxu1 %v4042_v40  ;;  %v4052_v60 = vpack.c.bf16 %v2536_v57, %v2535_v55 }
 0xa84   :  { %4045 = vmatprep.subr.bf16.mxu1 %v4044_v41  ;;  %v5161_v33 = vsub.s32 0, %v5158_v32  ;;  %v5169_v35 = vsub.s32 1, %v5158_v32  ;;  %v1951_v36 = vsub.s32 5, %v5158_v32  ;;  %v1943_v53 = vsub.s32 3, %v5158_v32 }
 0xa85   :  { %4027 = vmatpush3.bf16.msra.mxu0 %v4026_v46  ;;  %v5238_v28 = vsub.s32 7, %v5158_v32 }
 0xa86   :  { %4029 = vmatprep.subr.bf16.mxu0 %v4028_v56  ;;  %v1932_v37 = vrot.slane %v5166_v34, %v5161_v33  ;;  %v1936_v39 = vrot.slane %v5166_v34, %v5169_v35  ;;  %v5182_v40 = vrot.slane %v5166_v34, %v1951_v36  ;;  %v2368_v44 = vrot.slane %v5177_v38, %v5161_v33 }
 0xa87   :  { %4047 = vmatpush3.bf16.msra.mxu1 %v4046_v4  ;;  %v2372_v51 = vrot.slane %v5177_v38, %v5169_v35  ;;  %v5199_v56 = vrot.slane %v5177_v38, %v1951_v36  ;;  %v2430_v59 = vrot.slane %v5191_v45, %v5169_v35  ;;  %v5228_v17 = vrot.slane %v5177_v38, %v1943_v53 }
 0xa88   :  { %4049 = vmatprep.subr.bf16.mxu1 %v4048_v47  ;;  %v1939_v47 = vsub.s32 2, %v5158_v32 }
 0xa89   :  { %4031 = vmatpush3.bf16.msra.mxu0 %v4030_v61  ;;  %v2426_v61 = vrot.slane %v5191_v45, %v5161_v33 }
 0xa8a   :  { %4033 = vmatprep.subr.bf16.mxu0 %v4032_v6  ;;  %v1940_v2 = vrot.slane %v5166_v34, %v1939_v47 }
 0xa8b   :  { %4051 = vmatpush3.bf16.msra.mxu1 %v4050_v52 }
 0xa8c   :  { %4053 = vmatprep.subr.bf16.mxu1 %v4052_v60 }
 0xa8d   :  { %4035 = vmatpush3.bf16.msra.mxu0 %v4034_v13  ;;  %v2376_v13 = vrot.slane %v5177_v38, %v1939_v47 }
 0xa8e   :  { %4069 = vmatprep.subr.bf16.mxu0 %v4068_v49 }
 0xa8f   :  { %4055 = vmatpush3.bf16.msra.mxu1 %v4054_v1 }
 0xa90   :  { %4057 = vmatprep.subr.bf16.mxu1 %v4056_v9  ;;  %v1944_v9 = vrot.slane %v5166_v34, %v1943_v53 }
 0xa93   :  { %4059 = vmatpush3.bf16.msra.mxu1 %v4058_v14  ;;  %v5225_v14 = vrot.slane %v5191_v45, %v1951_v36  ;;  %v5247_v36 = vrot.slane %v5191_v45, %v1939_v47 }
 0xa94   :  { %4061 = vmatprep.subr.bf16.mxu1 %v4060_v18 }
 0xa97   :  { %4063 = vmatpush3.bf16.msra.mxu1 %v4062_v21 }
 0xa98   :  { %4065 = vmatprep.subr.bf16.mxu1 %v4064_v25  ;;  %v2546_v25 = vld [vmem:[%s5694_s8 + $0x218] sm:$0xff] }
 0xa9b   :  { %4067 = vmatpush3.bf16.msra.mxu1 %v4066_v27 }
 0xa9c   :  { %4101 = vmatprep.subr.bf16.mxu1 %v4100_v30  ;;  %v2564_v30 = vld [vmem:[%s5694_s8 + $0x2a8] sm:$0xff] }
 0xb41   :  { %v2089_v41 = vpop.f32.mrb[6].mxu1  ;;  %v5184_v42 = vpop.f32.mrb[40].mxu0 }
 0xb42   :  { %v4198_v43 = vadd.f32 %v2089_v41, %v1932_v37  ;;  %v2091_v46 = vpop.f32.mrb[7].mxu1  ;;  %v2245_v4 = vpop.f32.mrb[41].mxu0 }
 0xb43   :  { %v4199_v48 = vadd.f32 %v2091_v46, %v1936_v39  ;;  %v4207_v52 = vadd.f32 %v2245_v4, %v5182_v40  ;;  %v2547_v46 = vld [vmem:[%s5694_s8 + $0x220] sm:$0xff]  ;;  %v2548_v4 = vld [vmem:[%s5694_s8 + $0x228] sm:$0xff] }
 0xb44   :  { %v2347_v54 = vmax.f32 %v4198_v43, 0.0  ;;  %v4074_v43 = vpack.c.bf16 %v2546_v25, %v2545_v24  ;;  %v5302_v24 = vrot.slane %v5177_v38, %v5238_v28  ;;  %v2568_v25 = vld [vmem:[%s5694_s8 + $0x2c8] sm:$0xff] }
 0xb45   :  { %v2348_v55 = vmax.f32 %v4199_v48, 0.0  ;;  %v2095_v57 = vpop.f32.mrb[8].mxu1  ;;  %v5201_v58 = vpop.f32.mrb[42].mxu0  ;;  %v2352_v7 = vmax.f32 %v4207_v52, 0.0 }
 0xb46   :  { %v2405_v60 = vmul.f32 %v2368_v44, %v2347_v54  ;;  %v4200_v62 = vadd.f32 %v2095_v57, %v1932_v37  ;;  %v2097_v63 = vpop.f32.mrb[9].mxu1  ;;  %v5207_v1 = vpop.f32.mrb[43].mxu0  ;;  %v4076_v54 = vpack.c.bf16 %v2564_v30, %v2563_v29  ;;  %v2565_v57 = vld [vmem:[%s5694_s8 + $0x2b0] sm:$0xff] }
 0xb47   :  { %v2406_v6 = vmul.f32 %v2372_v51, %v2348_v55  ;;  %v4201_v8 = vadd.f32 %v2097_v63, %v1936_v39  ;;  %v2410_v50 = vmul.f32 %v5199_v56, %v2352_v7  ;;  %v2575_v55 = vld [vmem:[%s5694_s8 + $0x300] sm:$0xff]  ;;  %v2566_v63 = vld [vmem:[%s5694_s8 + $0x2b8] sm:$0xff] }
 0xb48   :  { %v2355_v12 = vmax.f32 %v4200_v62, 0.0  ;;  %v2463_v19 = vadd.f32 %v2426_v61, %v2405_v60 }
 0xb49   :  { %v2356_v15 = vmax.f32 %v4201_v8, 0.0  ;;  %v2166_v16 = vpop.f32.mrb[10].mxu1  ;;  %v2464_v18 = vadd.f32 %v2430_v59, %v2406_v6  ;;  %v2468_v62 = vadd.f32 %v5225_v14, %v2410_v50  ;;  %v2595_v50 = vld [vmem:[%s5694_s8 + $0x3a0] sm:$0xff] }
 0xb4a   :  { %v2413_v20 = vmul.f32 %v2368_v44, %v2355_v12  ;;  %v4202_v49 = vadd.f32 %v2166_v16, %v1940_v2  ;;  %v2168_v21 = vpop.f32.mrb[11].mxu1  ;;  %v2438_v44 = vrot.slane %v5191_v45, %v1943_v53  ;;  %v2576_v53 = vld [vmem:[%s5694_s8 + $0x308] sm:$0xff]  ;;  %v2550_v12 = vld [vmem:[%s5694_s8 + $0x238] sm:$0xff] }
 0xb4b   :  { %v2414_v26 = vmul.f32 %v2372_v51, %v2356_v15  ;;  %v4203_v27 = vadd.f32 %v2168_v21, %v1944_v9  ;;  %2678 = vmatprep.mubr.f32.mxu0 %v2464_v18  ;;  %v4102_v10 = vpack.c.bf16 %v2576_v53, %v2575_v55  ;;  %v2567_v21 = vld [vmem:[%s5694_s8 + $0x2c0] sm:$0xff]  ;;  %v2598_v55 = vld [vmem:[%s5694_s8 + $0x3b8] sm:$0xff] }
 0xb4c   :  { %v2349_v31 = vmax.f32 %v4202_v49, 0.0  ;;  %2679 = vmatmul.mubr.f32.vlgmr.msra.gmra.mrb[44].mxu0 %v2463_v19  ;;  %v2471_v52 = vadd.f32 %v2426_v61, %v2413_v20  ;;  %v5269_v61 = vrot.slane %v5166_v34, %v5238_v28  ;;  %v2577_v20 = vld [vmem:[%s5694_s8 + $0x310] sm:$0xff]  ;;  %v2578_v49 = vld [vmem:[%s5694_s8 + $0x318] sm:$0xff] }
 0xb4d   :  { %v2350_v37 = vmax.f32 %v4203_v27, 0.0  ;;  %4071 = vmatpush3.bf16.msra.mxu0 %v4070_v23  ;;  %v2172_v39 = vpop.f32.mrb[12].mxu1  ;;  %v2472_v41 = vadd.f32 %v2430_v59, %v2414_v26  ;;  %v4080_v23 = vpack.c.bf16 %v2566_v63, %v2565_v57  ;;  %v2596_v26 = vld [vmem:[%s5694_s8 + $0x3a8] sm:$0xff] }
 0xb4e   :  { %v2407_v48 = vmul.f32 %v2376_v13, %v2349_v31  ;;  %v4204_v51 = vadd.f32 %v2172_v39, %v1940_v2  ;;  %v2174_v47 = vpop.f32.mrb[13].mxu1  ;;  %4073 = vmatprep.subr.bf16.mxu0 %v4072_v22  ;;  %v2593_v2 = vld [vmem:[%s5694_s8 + $0x390] sm:$0xff]  ;;  %v4106_v31 = vpack.c.bf16 %v2578_v49, %v2577_v20  ;;  %v2551_v39 = vld [vmem:[%s5694_s8 + $0x240] sm:$0xff] }
 0xb4f   :  { %v2408_v59 = vmul.f32 %v5228_v17, %v2350_v37  ;;  %v4205_v60 = vadd.f32 %v2174_v47, %v1944_v9  ;;  %2683 = vmatprep.mubr.f32.mxu0 %v2472_v41  ;;  %v4078_v9 = vpack.c.bf16 %v2548_v4, %v2547_v46  ;;  %v4104_v19 = vpack.c.bf16 %v2594_v3, %v2593_v2  ;;  %v2552_v41 = vld [vmem:[%s5694_s8 + $0x248] sm:$0xff]  ;;  %v2569_v47 = vld [vmem:[%s5694_s8 + $0x2d0] sm:$0xff] }
 0xb50   :  { %v2357_v5 = vmax.f32 %v4204_v51, 0.0  ;;  %2684 = vmatmul.mubr.f32.gmra.mrb[46].mxu0 %v2471_v52  ;;  %v2465_v15 = vadd.f32 %v5247_v36, %v2407_v48  ;;  %v5317_v37 = vrot.slane %v5191_v45, %v5238_v28  ;;  %v4084_v4 = vpack.c.bf16 %v2568_v25, %v2567_v21  ;;  %v2579_v48 = vld [vmem:[%s5694_s8 + $0x320] sm:$0xff]  ;;  %v2580_v51 = vld [vmem:[%s5694_s8 + $0x328] sm:$0xff]  ;;  %v2601_v25 = vld [vmem:[%s5694_s8 + $0x3d0] sm:$0xff] }
 0xb51   :  { %v2358_v6 = vmax.f32 %v4205_v60, 0.0  ;;  %4075 = vmatpush3.bf16.msra.mxu0 %v4074_v43  ;;  %v5280_v7 = vpop.f32.mrb[14].mxu1  ;;  %2828 = vmatprep.mubr.f32.mxu0 %v2468_v62  ;;  %v2466_v8 = vadd.f32 %v2438_v44, %v2408_v59  ;;  %v5326_v43 = vsub.s32 4, %v5158_v32  ;;  %v4108_v28 = vpack.c.bf16 %v2596_v26, %v2595_v50  ;;  %v2553_v60 = vld [vmem:[%s5694_s8 + $0x250] sm:$0xff]  ;;  %v2554_v62 = vld [vmem:[%s5694_s8 + $0x258] sm:$0xff]  ;;  %v2584_v21 = vld [vmem:[%s5694_s8 + $0x348] sm:$0xff] }
 0xb52   :  { %v2415_v16 = vmul.f32 %v2376_v13, %v2357_v5  ;;  %v2322_v18 = vpop.f32.mrb[15].mxu1  ;;  %4077 = vmatprep.subr.bf16.mxu0 %v4076_v54  ;;  %v2597_v54 = vld [vmem:[%s5694_s8 + $0x3b0] sm:$0xff]  ;;  %v4086_v57 = vpack.c.bf16 %v2552_v41, %v2551_v39  ;;  %v4110_v59 = vpack.c.bf16 %v2580_v51, %v2579_v48  ;;  %v2602_v50 = vld [vmem:[%s5694_s8 + $0x3d8] sm:$0xff]  ;;  %v2604_v48 = vld [vmem:[%s5694_s8 + $0x3e8] sm:$0xff] }
 0xb53   :  { %v2416_v22 = vmul.f32 %v5228_v17, %v2358_v6  ;;  %v4211_v13 = vadd.f32 %v2322_v18, %v5269_v61  ;;  %2753 = vmatprep.mubr.f32.mxu1 %v2466_v8  ;;  %v4082_v17 = vpack.c.bf16 %v2550_v12, %v2549_v11  ;;  %v1948_v63 = vrot.slane %v5166_v34, %v5326_v43  ;;  %v2581_v5 = vld [vmem:[%s5694_s8 + $0x330] sm:$0xff]  ;;  %v2582_v6 = vld [vmem:[%s5694_s8 + $0x338] sm:$0xff]  ;;  %v2571_v8 = vld [vmem:[%s5694_s8 + $0x2e0] sm:$0xff] }
 0xb54   :  { %2754 = vmatmul.mubr.f32.vlgmr.msra.gmra.mrb[18].mxu1 %v2465_v15  ;;  %v4112_v3 = vpack.c.bf16 %v2598_v55, %v2597_v54  ;;  %v2600_v11 = vld [vmem:[%s5694_s8 + $0x3c8] sm:$0xff]  ;;  %v5378_v12 = vsub.s32 6, %v5158_v32  ;;  %v4090_v15 = vpack.c.bf16 %v2554_v62, %v2553_v60  ;;  %v2555_v18 = vld [vmem:[%s5694_s8 + $0x260] sm:$0xff]  ;;  %v2384_v26 = vrot.slane %v5177_v38, %v5326_v43  ;;  %v2606_v60 = vld [vmem:[%s5694_s8 + $0x3f8] sm:$0xff] }
 0xb55   :  { %v2354_v27 = vmax.f32 %v4211_v13, 0.0  ;;  %4079 = vmatpush3.bf16.msra.mxu0 %v4078_v9  ;;  %4103 = vmatpush3.bf16.msra.mxu1 %v4102_v10  ;;  %v5313_v29 = vpop.f32.mrb[16].mxu1  ;;  %v2474_v30 = vadd.f32 %v2438_v44, %v2416_v22  ;;  %v2473_v44 = vadd.f32 %v5247_v36, %v2415_v16  ;;  %v2570_v36 = vld [vmem:[%s5694_s8 + $0x2d8] sm:$0xff]  ;;  %v2572_v9 = vld [vmem:[%s5694_s8 + $0x2e8] sm:$0xff]  ;;  %v2599_v10 = vld [vmem:[%s5694_s8 + $0x3c0] sm:$0xff]  ;;  %v4114_v16 = vpack.c.bf16 %v2582_v6, %v2581_v5 }
 0xb56   :  { %v5328_v46 = vpop.f32.mrb[17].mxu1  ;;  %4081 = vmatprep.subr.bf16.mxu0 %v4080_v23  ;;  %4105 = vmatprep.subr.bf16.mxu1 %v4104_v19  ;;  %v4088_v2 = vpack.c.bf16 %v2570_v36, %v2569_v47  ;;  %v2556_v23 = vld [vmem:[%s5694_s8 + $0x268] sm:$0xff]  ;;  %v4206_v19 = vadd.f32 %v5184_v42, %v1948_v63  ;;  %v4092_v20 = vpack.c.bf16 %v2572_v9, %v2571_v8  ;;  %v2583_v32 = vld [vmem:[%s5694_s8 + $0x340] sm:$0xff]  ;;  %v2573_v22 = vld [vmem:[%s5694_s8 + $0x2f0] sm:$0xff] }
 0xb57   :  { %v2412_v52 = vmul.f32 %v5302_v24, %v2354_v27  ;;  %2758 = vmatprep.mubr.f32.mxu1 %v2474_v30  ;;  %v4116_v49 = vpack.c.bf16 %v2600_v11, %v2599_v10  ;;  %v4209_v13 = vadd.f32 %v5207_v1, %v5182_v40  ;;  %v2574_v42 = vld [vmem:[%s5694_s8 + $0x2f8] sm:$0xff]  ;;  %v4094_v40 = vpack.c.bf16 %v2556_v23, %v2555_v18  ;;  %v2557_v27 = vld [vmem:[%s5694_s8 + $0x270] sm:$0xff]  ;;  %v2587_v36 = vld [vmem:[%s5694_s8 + $0x360] sm:$0xff] }
 0xb58   :  { %2759 = vmatmul.mubr.f32.gmra.mrb[20].mxu1 %v2473_v44  ;;  %v4118_v1 = vpack.c.bf16 %v2584_v21, %v2583_v32  ;;  %v2351_v30 = vmax.f32 %v4206_v19, 0.0  ;;  %v4096_v39 = vpack.c.bf16 %v2574_v42, %v2573_v22  ;;  %v4120_v41 = vpack.c.bf16 %v2602_v50, %v2601_v25  ;;  %v2558_v44 = vld [vmem:[%s5694_s8 + $0x278] sm:$0xff]  ;;  %v2921_v21 = vld [vmem:[%s5698_s10 + $0x28] sm:$0xff]  ;;  %v2920_v42 = vld [vmem:[%s5698_s10 + $0x20] sm:$0xff] }
 0xb59   :  { %4083 = vmatpush3.bf16.msra.mxu0 %v4082_v17  ;;  %4107 = vmatpush3.bf16.msra.mxu1 %v4106_v31  ;;  %v2470_v53 = vadd.f32 %v5317_v37, %v2412_v52  ;;  %v1956_v17 = vrot.slane %v5166_v34, %v5378_v12  ;;  %v4208_v31 = vadd.f32 %v5201_v58, %v1948_v63  ;;  %v2585_v34 = vld [vmem:[%s5694_s8 + $0x350] sm:$0xff]  ;;  %v2603_v58 = vld [vmem:[%s5694_s8 + $0x3e0] sm:$0xff]  ;;  %v2923_v22 = vld [vmem:[%s5698_s10 + $0x38] sm:$0xff] }
 0xb5a   :  { %4085 = vmatprep.subr.bf16.mxu0 %v4084_v4  ;;  %4109 = vmatprep.subr.bf16.mxu1 %v4108_v28  ;;  %v2586_v4 = vld [vmem:[%s5694_s8 + $0x358] sm:$0xff]  ;;  %v2360_v28 = vmax.f32 %v4209_v13, 0.0  ;;  %v2442_v51 = vrot.slane %v5191_v45, %v5326_v43  ;;  %v4098_v47 = vpack.c.bf16 %v2558_v44, %v2557_v27  ;;  %v2409_v54 = vmul.f32 %v2384_v26, %v2351_v30  ;;  %v2605_v43 = vld [vmem:[%s5694_s8 + $0x3f0] sm:$0xff]  ;;  %v2925_v50 = vld [vmem:[%s5698_s10 + $0x48] sm:$0xff] }
 0xb5b   :  { %2903 = vmatprep.mubr.f32.mxu1 %v2470_v53  ;;  %v4122_v52 = vpack.c.bf16 %v2586_v4, %v2585_v34  ;;  %v2359_v55 = vmax.f32 %v4208_v31, 0.0  ;;  %v4210_v53 = vadd.f32 %v5280_v7, %v1956_v17  ;;  %v4213_v7 = vadd.f32 %v5328_v46, %v5269_v61  ;;  %v2590_v61 = vld [vmem:[%s5694_s8 + $0x378] sm:$0xff]  ;;  %v2922_v25 = vld [vmem:[%s5698_s10 + $0x30] sm:$0xff]  ;;  %v2929_v30 = vld [vmem:[%s5698_s10 + $0x68] sm:$0xff] }
 0xb5c   :  { %v2418_v62 = vmul.f32 %v5199_v56, %v2360_v28  ;;  %v2392_v63 = vrot.slane %v5177_v38, %v5378_v12  ;;  %v2467_v5 = vadd.f32 %v2442_v51, %v2409_v54  ;;  %v4212_v9 = vadd.f32 %v5313_v29, %v1956_v17  ;;  %v2589_v56 = vld [vmem:[%s5694_s8 + $0x370] sm:$0xff]  ;;  %v2927_v17 = vld [vmem:[%s5698_s10 + $0x58] sm:$0xff]  ;;  %v2928_v44 = vld [vmem:[%s5698_s10 + $0x60] sm:$0xff] }
 0xb5d   :  { %4087 = vmatpush3.bf16.msra.mxu0 %v4086_v57  ;;  %4111 = vmatpush3.bf16.msra.mxu1 %v4110_v59  ;;  %v4124_v57 = vpack.c.bf16 %v2604_v48, %v2603_v58  ;;  %v2588_v59 = vld [vmem:[%s5694_s8 + $0x368] sm:$0xff]  ;;  %v2417_v6 = vmul.f32 %v2384_v26, %v2359_v55  ;;  %v2353_v8 = vmax.f32 %v4210_v53, 0.0  ;;  %v2362_v46 = vmax.f32 %v4213_v7, 0.0  ;;  %v2931_v31 = vld [vmem:[%s5698_s10 + $0x78] sm:$0xff]  ;;  %v2930_v34 = vld [vmem:[%s5698_s10 + $0x70] sm:$0xff] }
 0xb5e   :  { %4089 = vmatprep.subr.bf16.mxu0 %v4088_v2  ;;  %4113 = vmatprep.subr.bf16.mxu1 %v4112_v3  ;;  %v4126_v2 = vpack.c.bf16 %v2588_v59, %v2587_v36  ;;  %v4128_v3 = vpack.c.bf16 %v2606_v60, %v2605_v43  ;;  %v2476_v38 = vadd.f32 %v5225_v14, %v2418_v62  ;;  %v2933_v4 = vld [vmem:[%s5698_s10 + $0x88] sm:$0xff]  ;;  %v2935_v28 = vld [vmem:[%s5698_s10 + $0x98] sm:$0xff]  ;;  %v2936_v53 = vld [vmem:[%s5698_s10 + $0xa0] sm:$0xff] }
 0xb5f   :  { %v4130_v10 = vpack.c.bf16 %v2590_v61, %v2589_v56  ;;  %v2411_v11 = vmul.f32 %v2392_v63, %v2353_v8  ;;  %v2450_v29 = vrot.slane %v5191_v45, %v5378_v12  ;;  %v2420_v18 = vmul.f32 %v5302_v24, %v2362_v46  ;;  %v2917_v45 = vld [vmem:[%s5698_s10 + $0x8] sm:$0xff]  ;;  %v2919_v24 = vld [vmem:[%s5698_s10 + $0x18] sm:$0xff]  ;;  %v2940_v7 = vld [vmem:[%s5698_s10 + $0xc0] sm:$0xff] }
 0xb60   :  { %v4132_v12 = vpack.c.bf16 %v2919_v24, %v2917_v45  ;;  %v4136_v13 = vpack.c.bf16 %v2923_v22, %v2921_v21  ;;  %v4138_v26 = vpack.c.bf16 %v2922_v25, %v2920_v42  ;;  %v4140_v27 = vpack.c.bf16 %v2927_v17, %v2925_v50  ;;  %v2937_v36 = vld [vmem:[%s5698_s10 + $0xa8] sm:$0xff]  ;;  %v2939_v54 = vld [vmem:[%s5698_s10 + $0xb8] sm:$0xff]  ;;  %v2944_v8 = vld [vmem:[%s5698_s10 + $0xe0] sm:$0xff] }
 0xb61   :  { %4091 = vmatpush3.bf16.msra.mxu0 %v4090_v15  ;;  %4115 = vmatpush3.bf16.msra.mxu1 %v4114_v16  ;;  %v2361_v15 = vmax.f32 %v4212_v9, 0.0  ;;  %v2475_v16 = vadd.f32 %v2442_v51, %v2417_v6  ;;  %v2469_v23 = vadd.f32 %v2450_v29, %v2411_v11  ;;  %v2478_v14 = vadd.f32 %v5317_v37, %v2420_v18  ;;  %v2918_v37 = vld [vmem:[%s5698_s10 + $0x10] sm:$0xff]  ;;  %v2932_v51 = vld [vmem:[%s5698_s10 + $0x80] sm:$0xff]  ;;  %v2941_v43 = vld [vmem:[%s5698_s10 + $0xc8] sm:$0xff] }
 0xb62   :  { %4093 = vmatprep.subr.bf16.mxu0 %v4092_v20  ;;  %4117 = vmatprep.subr.bf16.mxu1 %v4116_v49  ;;  %v2916_v49 = vld [vmem:[%s5698_s10] sm:$0xff]  ;;  %v4146_v58 = vpack.c.bf16 %v2930_v34, %v2928_v44  ;;  %v4148_v48 = vpack.c.bf16 %v2935_v28, %v2933_v4  ;;  %v4152_v55 = vpack.c.bf16 %v2939_v54, %v2937_v36  ;;  %v2943_v60 = vld [vmem:[%s5698_s10 + $0xd8] sm:$0xff]  ;;  %v2946_v9 = vld [vmem:[%s5698_s10 + $0xf0] sm:$0xff] }
 0xb63   :  { %v2419_v19 = vmul.f32 %v2392_v63, %v2361_v15  ;;  %v4134_v32 = vpack.c.bf16 %v2918_v37, %v2916_v49  ;;  %v4156_v62 = vpack.c.bf16 %v2943_v60, %v2941_v43  ;;  %v2942_v63 = vld [vmem:[%s5698_s10 + $0xd0] sm:$0xff]  ;;  %v4162_v56 = vpack.c.bf16 %v2946_v9, %v2944_v8  ;;  %v3089_v61 = vld [vmem:[%s5699_s14 + $0x80] sm:$0xff]  ;;  %v3090_v46 = vld [vmem:[%s5699_s14 + $0x88] sm:$0xff] }
 0xb64   :  { %v3074_v11 = vld [vmem:[%s5699_s14 + $0x8] sm:$0xff]  ;;  %v3092_v15 = vld [vmem:[%s5699_s14 + $0x98] sm:$0xff]  ;;  %v3095_v37 = vld [vmem:[%s5699_s14 + $0xb0] sm:$0xff] }
 0xb65   :  { %4095 = vmatpush3.bf16.msra.mxu0 %v4094_v40  ;;  %4119 = vmatpush3.bf16.msra.mxu1 %v4118_v1  ;;  %v2477_v20 = vadd.f32 %v2450_v29, %v2419_v19  ;;  %v2924_v40 = vld [vmem:[%s5698_s10 + $0x40] sm:$0xff]  ;;  %v2926_v1 = vld [vmem:[%s5698_s10 + $0x50] sm:$0xff]  ;;  %v3076_v19 = vld [vmem:[%s5699_s14 + $0x18] sm:$0xff] }
 0xb66   :  { %4097 = vmatprep.subr.bf16.mxu0 %v4096_v39  ;;  %4121 = vmatprep.subr.bf16.mxu1 %v4120_v41  ;;  %v4142_v39 = vpack.c.bf16 %v2926_v1, %v2924_v40  ;;  %v4144_v41 = vpack.c.bf16 %v2931_v31, %v2929_v30  ;;  %v3091_v29 = vld [vmem:[%s5699_s14 + $0x90] sm:$0xff]  ;;  %v3078_v49 = vld [vmem:[%s5699_s14 + $0x28] sm:$0xff]  ;;  %v3080_v42 = vld [vmem:[%s5699_s14 + $0x38] sm:$0xff] }
 0xb67   :  { %v4168_v18 = vpack.c.bf16 %v3092_v15, %v3091_v29  ;;  %v3097_v25 = vld [vmem:[%s5699_s14 + $0xc0] sm:$0xff]  ;;  %v3098_v50 = vld [vmem:[%s5699_s14 + $0xc8] sm:$0xff]  ;;  %v3100_v30 = vld [vmem:[%s5699_s14 + $0xd8] sm:$0xff] }
 0xb68   :  { %v4180_v17 = vpack.c.bf16 %v3098_v50, %v3097_v25  ;;  %v3081_v40 = vld [vmem:[%s5699_s14 + $0x40] sm:$0xff]  ;;  %v3082_v1 = vld [vmem:[%s5699_s14 + $0x48] sm:$0xff]  ;;  %v3083_v29 = vld [vmem:[%s5699_s14 + $0x50] sm:$0xff] }
 0xb69   :  { %4099 = vmatpush3.bf16.msra.mxu0 %v4098_v47  ;;  %4123 = vmatpush3.bf16.msra.mxu1 %v4122_v52  ;;  %v2934_v47 = vld [vmem:[%s5698_s10 + $0x90] sm:$0xff]  ;;  %v4182_v31 = vpack.c.bf16 %v3082_v1, %v3081_v40  ;;  %v3084_v15 = vld [vmem:[%s5699_s14 + $0x58] sm:$0xff] }
 0xb6a   :  { %4125 = vmatprep.subr.bf16.mxu1 %v4124_v57  ;;  %4133 = vmatprep.subr.bf16.mxu0 %v4132_v12  ;;  %v4150_v52 = vpack.c.bf16 %v2934_v47, %v2932_v51  ;;  %v2938_v57 = vld [vmem:[%s5698_s10 + $0xb0] sm:$0xff]  ;;  %v3077_v12 = vld [vmem:[%s5699_s14 + $0x20] sm:$0xff] }
 0xb6b   :  { %v4154_v59 = vpack.c.bf16 %v2938_v57, %v2936_v53  ;;  %v4174_v21 = vpack.c.bf16 %v3078_v49, %v3077_v12  ;;  %v3087_v49 = vld [vmem:[%s5699_s14 + $0x70] sm:$0xff] }
 0xb6c   :  { %2829 = vmatmul.mubr.f32.vlgmr.msra.gmra.mrb[48].mxu0 %v2467_v5  ;;  %v2947_v5 = vld [vmem:[%s5698_s10 + $0xf8] sm:$0xff] }
 0xb6d   :  { %2833 = vmatprep.mubr.f32.mxu0 %v2476_v38  ;;  %4127 = vmatpush3.bf16.msra.mxu1 %v4126_v2  ;;  %v4158_v2 = vpack.c.bf16 %v2942_v63, %v2940_v7  ;;  %v3073_v38 = vld [vmem:[%s5699_s14] sm:$0xff] }
 0xb6e   :  { %4129 = vmatprep.subr.bf16.mxu1 %v4128_v3  ;;  %4135 = vmatpush1.bf16.msra.mxu0 %v4134_v32  ;;  %v2945_v3 = vld [vmem:[%s5698_s10 + $0xe8] sm:$0xff]  ;;  %v3096_v32 = vld [vmem:[%s5699_s14 + $0xb8] sm:$0xff] }
 0xb6f   :  { %4137 = vmatprep.subr.bf16.mxu0 %v4136_v13  ;;  %v4160_v6 = vpack.c.bf16 %v2947_v5, %v2945_v3  ;;  %v4176_v22 = vpack.c.bf16 %v3096_v32, %v3095_v37  ;;  %v3079_v13 = vld [vmem:[%s5699_s14 + $0x30] sm:$0xff]  ;;  %v3088_v37 = vld [vmem:[%s5699_s14 + $0x78] sm:$0xff] }
 0xb70   :  { %2834 = vmatmul.mubr.f32.gmra.mrb[50].mxu0 %v2475_v16  ;;  %v4166_v16 = vpack.c.bf16 %v3074_v11, %v3073_v38  ;;  %v4194_v32 = vpack.c.bf16 %v3088_v37, %v3087_v49 }
 0xb71   :  { %4131 = vmatpush3.bf16.msra.mxu1 %v4130_v10  ;;  %3024 = vmatprep.mubr.f32.mxu0 %v4251_v0  ;;  %v4164_v10 = vpack.c.bf16 %v3090_v46, %v3089_v61 }
 0xb72   :  { %4139 = vmatpush1.bf16.msra.mxu0 %v4138_v26  ;;  %v4178_v26 = vpack.c.bf16 %v3080_v42, %v3079_v13  ;;  %v3041_v13 = vld [vmem:[%s5703_s12] sm:$0x3] }
 0xb73   :  { %4141 = vmatprep.subr.bf16.mxu0 %v4140_v27  ;;  %4165 = vmatprep.subr.bf16.mxu1 %v4164_v10  ;;  %v3099_v27 = vld [vmem:[%s5699_s14 + $0xd0] sm:$0xff] }
 0xb74   :  { %2904 = vmatmul.mubr.f32.vlgmr.msra.gmra.mrb[22].mxu1 %v2469_v23  ;;  %v3075_v23 = vld [vmem:[%s5699_s14 + $0x10] sm:$0xff] }
 0xb75   :  { %2908 = vmatprep.mubr.f32.mxu1 %v2478_v14  ;;  %v3093_v14 = vld [vmem:[%s5699_s14 + $0xa0] sm:$0xff]  ;;  %4167 = vmatpush3.bf16.msra.mxu1 %v4166_v16  ;;  %v4170_v45 = vpack.c.bf16 %v3076_v19, %v3075_v23  ;;  %v4186_v16 = vpack.c.bf16 %v3084_v15, %v3083_v29 }
 0xb76   :  { %4143 = vmatpush1.bf16.msra.mxu0 %v4142_v39  ;;  %4169 = vmatprep.subr.bf16.mxu1 %v4168_v18  ;;  %v4184_v39 = vpack.c.bf16 %v3100_v30, %v3099_v27  ;;  %v3102_v18 = vld [vmem:[%s5699_s14 + $0xe8] sm:$0xff]  ;;  %v3085_v19 = vld [vmem:[%s5699_s14 + $0x60] sm:$0xff]  ;;  %v3050_v27 = vrot.slane %v3041_v13, %v5169_v35 }
 0xb77   :  { %4145 = vmatprep.subr.bf16.mxu0 %v4144_v41 }
 0xb78   :  { %2909 = vmatmul.mubr.f32.gmra.mrb[24].mxu1 %v2477_v20  ;;  %v3094_v20 = vld [vmem:[%s5699_s14 + $0xa8] sm:$0xff] }
 0xb79   :  { %v4172_v24 = vpack.c.bf16 %v3094_v20, %v3093_v14  ;;  %4171 = vmatpush3.bf16.msra.mxu1 %v4170_v45  ;;  %v3086_v14 = vld [vmem:[%s5699_s14 + $0x68] sm:$0xff]  ;;  %v3103_v45 = vld [vmem:[%s5699_s14 + $0xf0] sm:$0xff] }
 0xb7a   :  { %4147 = vmatpush1.bf16.msra.mxu0 %v4146_v58  ;;  %v4190_v20 = vpack.c.bf16 %v3086_v14, %v3085_v19 }
 0xb7b   :  { %4149 = vmatprep.subr.bf16.mxu0 %v4148_v48  ;;  %4173 = vmatprep.subr.bf16.mxu1 %v4172_v24  ;;  %v3248_v48 = vld [vmem:[%s5700_s9] ss:$0 sm:$0xff]  ;;  %v3104_v24 = vld [vmem:[%s5699_s14 + $0xf8] sm:$0xff] }
 0xb7c   :  { %v4192_v12 = vpack.c.bf16 %v3104_v24, %v3103_v45 }
 0xb7d   :  { %4175 = vmatpush3.bf16.msra.mxu1 %v4174_v21  ;;  %v2948_v21 = vld [vmem:[%s5702_s11] sm:$0x3] }
 0xb7e   :  { %4151 = vmatpush1.bf16.msra.mxu0 %v4150_v52  ;;  %4177 = vmatprep.subr.bf16.mxu1 %v4176_v22  ;;  %v2953_v22 = vrot.slane %v2948_v21, %v5161_v33  ;;  %v2957_v42 = vrot.slane %v2948_v21, %v5169_v35 }
 0xb7f   :  { %4153 = vmatprep.subr.bf16.mxu0 %v4152_v55 }
 0xb81   :  { %4179 = vmatpush3.bf16.msra.mxu1 %v4178_v26  ;;  %v3046_v26 = vrot.slane %v3041_v13, %v5161_v33 }
 0xb82   :  { %4155 = vmatpush1.bf16.msra.mxu0 %v4154_v59  ;;  %4181 = vmatprep.subr.bf16.mxu1 %v4180_v17  ;;  %v3057_v17 = vld [vmem:[%s5704_s13] sm:$0x3] }
 0xb83   :  { %4157 = vmatprep.subr.bf16.mxu0 %v4156_v62 }
 0xb85   :  { %4183 = vmatpush3.bf16.msra.mxu1 %v4182_v31 }
 0xb86   :  { %4159 = vmatpush1.bf16.msra.mxu0 %v4158_v2  ;;  %4185 = vmatprep.subr.bf16.mxu1 %v4184_v39 }
 0xb87   :  { %4161 = vmatprep.subr.bf16.mxu0 %v4160_v6 }
 0xb89   :  { %4187 = vmatpush3.bf16.msra.mxu1 %v4186_v16 }
 0xb8a   :  { %4163 = vmatpush1.bf16.msra.mxu0 %v4162_v56 }
 0xc1f   :  { %v3398_v41 = vpop.f32.mrb[44].mxu0 }
 0xc20   :  { %v3399_v44 = vpop.f32.mrb[45].mxu0 }
 0xc21   :  { %v3400_v34 = vadd.f32 %v3399_v44, %v3398_v41  ;;  %v3066_v41 = vrot.slane %v3057_v17, %v5169_v35 }
 0xc23   :  { %v3401_v4 = vpop.f32.mrb[46].mxu0  ;;  %v2681_v52 = vadd.f32 %v3400_v34, %v3248_v48  ;;  %v3062_v34 = vrot.slane %v3057_v17, %v5161_v33  ;;  %v3249_v33 = vld [vmem:[%s5705_s15] ss:$0 sm:$0xff] }
 0xc24   :  { %v3402_v28 = vpop.f32.mrb[47].mxu0 }
 0xc25   :  { %v3403_v58 = vadd.f32 %v3402_v28, %v3401_v4 }
 0xc27   :  { %v3436_v51 = vpop.f32.mrb[18].mxu1  ;;  %v2686_v57 = vadd.f32 %v3403_v58, %v3248_v48 }
 0xc28   :  { %v3437_v47 = vpop.f32.mrb[19].mxu1 }
 0xc29   :  { %v3438_v36 = vadd.f32 %v3437_v47, %v3436_v51 }
 0xc2b   :  { %v2756_v54 = vadd.f32 %v3438_v36, %v2681_v52  ;;  %v3439_v55 = vpop.f32.mrb[20].mxu1 }
 0xc2c   :  { %v3440_v53 = vpop.f32.mrb[21].mxu1 }
 0xc2d   :  { %v3441_v59 = vadd.f32 %v3440_v53, %v3439_v55 }
 0xc2f   :  { %v2761_v43 = vadd.f32 %v3441_v59, %v2686_v57 }
 0xc3f   :  { %v3474_v60 = vpop.f32.mrb[48].mxu0 }
 0xc40   :  { %v3475_v62 = vpop.f32.mrb[49].mxu0 }
 0xc41   :  { %v3476_v7 = vadd.f32 %v3475_v62, %v3474_v60 }
 0xc43   :  { %v2831_v63 = vadd.f32 %v3476_v7, %v2756_v54  ;;  %v3477_v2 = vpop.f32.mrb[50].mxu0 }
 0xc44   :  { %v3478_v3 = vpop.f32.mrb[51].mxu0 }
 0xc45   :  { %v3479_v5 = vadd.f32 %v3478_v3, %v3477_v2 }
 0xc47   :  { %v2836_v6 = vadd.f32 %v3479_v5, %v2761_v43  ;;  %v3512_v8 = vpop.f32.mrb[22].mxu1 }
 0xc48   :  { %v3513_v9 = vpop.f32.mrb[23].mxu1 }
 0xc49   :  { %v3514_v56 = vadd.f32 %v3513_v9, %v3512_v8 }
 0xc4b   :  { %v2906_v61 = vadd.f32 %v3514_v56, %v2831_v63  ;;  %v3515_v46 = vpop.f32.mrb[24].mxu1 }
 0xc4c   :  { %v3516_v38 = vpop.f32.mrb[25].mxu1 }
 0xc4d   :  { %2914 = vst [vmem:[%s5701_s16] sm:$0xff] %v2906_v61  ;;  %v3517_v10 = vadd.f32 %v3516_v38, %v3515_v46  ;;  %3025 = vmatmul.mubr.f32.vlgmr.msra.gmra.mrb[52].mxu0 %v2906_v61 }
 0xc4e   :  { %3030 = vmatprep.mubr.f32.mxu0 %v4251_v0  ;;  %v3101_v0 = vld [vmem:[%s5699_s14 + $0xe0] sm:$0xff] }
 0xc4f   :  { %v2911_v11 = vadd.f32 %v3517_v10, %v2836_v6  ;;  %v4188_v23 = vpack.c.bf16 %v3102_v18, %v3101_v0 }
 0xc51   :  { %2915 = vst [vmem:[%s5701_s16 + $0x8] sm:$0xff] %v2911_v11  ;;  %3031 = vmatmul.mubr.f32.gmra.mrb[54].mxu0 %v2911_v11  ;;  %4189 = vmatprep.subr.bf16.mxu1 %v4188_v23 }
 0xc52   :  { %4191 = vmatpush3.bf16.msra.mxu1 %v4190_v20 }
 0xc53   :  { %4193 = vmatprep.subr.bf16.mxu1 %v4192_v12 }
 0xc56   :  { %4195 = vmatpush3.bf16.msra.mxu1 %v4194_v32 }
 0xd20   :  { %v3026_v25 = vpop.f32.mrb[52].mxu0 }
 0xd21   :  { %v3027_v50 = vadd.f32 %v3026_v25, %v2953_v22  ;;  %v3028_v40 = vpop.f32.mrb[53].mxu0 }
 0xd22   :  { %v3029_v1 = vadd.f32 %v3028_v40, %v2957_v42 }
 0xd23   :  { %v3037_v30 = vmax.f32 %v3027_v50, 0.0 }
 0xd24   :  { %v3038_v31 = vmax.f32 %v3029_v1, 0.0  ;;  %v3032_v39 = vpop.f32.mrb[54].mxu0 }
 0xd25   :  { %v3053_v44 = vmul.f32 %v3046_v26, %v3037_v30  ;;  %v3033_v4 = vadd.f32 %v3032_v39, %v2953_v22  ;;  %v3034_v28 = vpop.f32.mrb[55].mxu0 }
 0xd26   :  { %v3054_v58 = vmul.f32 %v3050_v27, %v3038_v31  ;;  %v3035_v48 = vadd.f32 %v3034_v28, %v2957_v42 }
 0xd27   :  { %v3039_v51 = vmax.f32 %v3033_v4, 0.0  ;;  %v3069_v36 = vadd.f32 %v3062_v34, %v3053_v44 }
 0xd28   :  { %v3040_v47 = vmax.f32 %v3035_v48, 0.0  ;;  %v3070_v52 = vadd.f32 %v3066_v41, %v3054_v58 }
 0xd29   :  { %v3055_v54 = vmul.f32 %v3046_v26, %v3039_v51 }
 0xd2a   :  { %v3056_v55 = vmul.f32 %v3050_v27, %v3040_v47  ;;  %3176 = vmatprep.mubr.f32.mxu1 %v3070_v52 }
 0xd2b   :  { %3177 = vmatmul.mubr.f32.vlgmr.msra.gmra.mrb[26].mxu1 %v3069_v36  ;;  %v3071_v57 = vadd.f32 %v3062_v34, %v3055_v54 }
 0xd2c   :  { %v3072_v53 = vadd.f32 %v3066_v41, %v3056_v55 }
 0xd2e   :  { %3181 = vmatprep.mubr.f32.mxu1 %v3072_v53 }
 0xd2f   :  { %3182 = vmatmul.mubr.f32.gmra.mrb[28].mxu1 %v3071_v57 }
 0xdfe   :  { %v3550_v35 = vpop.f32.mrb[26].mxu1 }
 0xdff   :  { %v3551_v59 = vpop.f32.mrb[27].mxu1 }
 0xe00   :  { %v3552_v43 = vadd.f32 %v3551_v59, %v3550_v35 }
 0xe02   :  { %v3179_v60 = vadd.f32 %v3552_v43, %v3249_v33  ;;  %v3553_v62 = vpop.f32.mrb[28].mxu1 }
 0xe03   :  { %v3554_v7 = vpop.f32.mrb[29].mxu1 }
 0xe04   :  { %3187 = vst [vmem:[%s5706_s17] sm:$0xff] %v3179_v60  ;;  %v3555_v63 = vadd.f32 %v3554_v7, %v3553_v62 }
 0xe06   :  { %v3184_v2 = vadd.f32 %v3555_v63, %v3249_v33 }
 0xe08   :  { %3188 = vst [vmem:[%s5706_s17 + $0x8] sm:$0xff] %v3184_v2 }

</bundles_post_ra>
